<compile_context>
chip_gen: v7x
topology: tpu7x:2x2x1
jax: 0.10.0
libtpu: 0.0.40
codegen_flags: <defaults>
</compile_context>

<pallas_src>
import functools

import jax
import jax.numpy as jnp
from jax import lax
from jax.experimental import pallas as pl
from jax.experimental.pallas import tpu as pltpu

EPS = 1e-5
NEG_SLOPE = 0.2


def _round_up(x, m):
    return (x + m - 1) // m * m


# --------------------------------------------------------------------------- #
# Geometry (cached)
# --------------------------------------------------------------------------- #
@functools.lru_cache(maxsize=None)
def _geometry(img_dim, hidden_dim):
    d1, d2, d3 = hidden_dim * 4, hidden_dim * 2, hidden_dim
    P = _round_up(d1, 128)            # uniform lane width of the slabs
    K1 = _round_up(img_dim, 16)       # bf16-sublane-aligned K of each layer
    K2 = _round_up(d1, 16)
    K3 = _round_up(d2, 16)
    o2 = K1                           # row offsets inside the weight slab
    o3 = o2 + K2
    o4 = o3 + K3
    total_rows = o4 + 16              # 16-row block holding w4^T (row 0)
    return d1, d2, d3, P, K1, K2, K3, o2, o3, o4, total_rows


# --------------------------------------------------------------------------- #
# Kernel (cached per (img_dim, hidden_dim))
# --------------------------------------------------------------------------- #
@functools.lru_cache(maxsize=None)
def _make_kernel(img_dim, hidden_dim):
    _, _, _, _, K1, K2, K3, o2, o3, o4, _ = _geometry(img_dim, hidden_dim)

    def kernel(x_ref, w_ref, v_ref, b_ref, o_ref):
        def bn_lrelu(z, g, be):
            # Two-pass (centered) batch statistics + folded affine + LeakyReLU.
            mu = jnp.mean(z, axis=0, keepdims=True)
            zc = z - mu
            var = jnp.mean(zc * zc, axis=0, keepdims=True)
            scale = g * lax.rsqrt(var + EPS)          # EUP rsqrt
            zn = zc * scale + be                      # one FMA per element
            return jnp.maximum(zn, NEG_SLOPE * zn)    # LeakyReLU(0.2)

        v = v_ref[...]  # [8, P] f32: g1,be1,g2,be2,g3,be3,0,0

        # Layer 1: Linear(img_dim, 4H) (bias cancelled by BN) + BN + LReLU
        z = jnp.dot(x_ref[...].astype(jnp.bfloat16), w_ref[0:K1, :],
                    preferred_element_type=jnp.float32)
        h = bn_lrelu(z, v[0:1, :], v[1:2, :])

        # Layer 2: Linear(4H, 2H) + BN + LReLU  (padded cols stay exactly 0)
        z = jnp.dot(h[:, :K2].astype(jnp.bfloat16), w_ref[o2:o2 + K2, :],
                    preferred_element_type=jnp.float32)
        h = bn_lrelu(z, v[2:3, :], v[3:4, :])

        # Layer 3: Linear(2H, H) + BN + LReLU
        z = jnp.dot(h[:, :K3].astype(jnp.bfloat16), w_ref[o3:o3 + K3, :],
                    preferred_element_type=jnp.float32)
        h = bn_lrelu(z, v[4:5, :], v[5:6, :])

        # Layer 4: Linear(H, 1) + b4, computed transposed -> lane-dense [16, B]
        # (row 0 of w4r holds w4^T; padded lanes of h and w4r are both zero).
        w4r = w_ref[o4:o4 + 16, :]                       # [16, P] bf16
        out = lax.dot_general(
            w4r, h.astype(jnp.bfloat16),
            dimension_numbers=(((1,), (1,)), ((), ())),
            preferred_element_type=jnp.float32)          # [16, B]
        o_ref[...] = out + b_ref[0]                      # SMEM scalar bias

    return kernel


# --------------------------------------------------------------------------- #
# Wrapper (jit-ed; pallas_call built once per shape via jit's trace cache)
# --------------------------------------------------------------------------- #
@functools.partial(jax.jit, static_argnames=("img_dim", "hidden_dim"))
def discriminator_forward(x, w_slab, v_slab, b4, *, img_dim, hidden_dim):
    """x: [B, img_dim] (bf16 preferred). Returns logits [B, 1] f32."""
    B = x.shape[0]
    _, _, _, _, K1, _, _, _, _, _, _ = _geometry(img_dim, hidden_dim)

    if x.dtype != jnp.bfloat16:          # no-op on the intended bf16 path
        x = x.astype(jnp.bfloat16)
    if x.shape[1] != K1:                 # only if img_dim not 16-aligned
        x = jnp.pad(x, ((0, 0), (0, K1 - x.shape[1])))

    vmem = pl.BlockSpec(memory_space=pltpu.MemorySpace.VMEM)
    smem = pl.BlockSpec(memory_space=pltpu.MemorySpace.SMEM)

    out16 = pl.pallas_call(
        _make_kernel(img_dim, hidden_dim),
        out_shape=jax.ShapeDtypeStruct((16, B), jnp.float32),
        in_specs=[vmem, vmem, vmem, smem],
        out_specs=vmem,
    )(x, w_slab, v_slab, b4)

    # Row 0 of the lane-dense slab is the logit vector; trivial fused reshape.
    return out16[0].reshape(B, 1)


# --------------------------------------------------------------------------- #
# Parameter construction / packing
# --------------------------------------------------------------------------- #
def init_params(key, img_dim, hidden_dim):
    """PyTorch-layout synthetic params; Linear weights stored as [in, out]."""
    dims = [(img_dim, hidden_dim * 4),
            (hidden_dim * 4, hidden_dim * 2),
            (hidden_dim * 2, hidden_dim),
            (hidden_dim, 1)]
    params = []
    for li, (din, dout) in enumerate(dims):
        key, kw, kb, kg, kbe = jax.random.split(key, 5)
        bound = 1.0 / (din ** 0.5)
        w = jax.random.uniform(kw, (din, dout), jnp.float32, -bound, bound)
        b = jax.random.uniform(kb, (1, dout), jnp.float32, -bound, bound)
        params += [w, b]
        if li < 3:  # BatchNorm affine params
            g = 1.0 + 0.1 * jax.random.normal(kg, (1, dout), jnp.float32)
            be = 0.1 * jax.random.normal(kbe, (1, dout), jnp.float32)
            params += [g, be]
    return tuple(params)


def pack_params(params, img_dim, hidden_dim):
    """Pack params into one bf16 weight slab, one f32 vector slab, b4 scalar."""
    (w1, b1, g1, be1, w2, b2, g2, be2, w3, b3, g3, be3, w4, b4) = params
    d1, d2, d3, P, K1, K2, K3, o2, o3, o4, total_rows = _geometry(
        img_dim, hidden_dim)

    w_slab = jnp.zeros((total_rows, P), jnp.float32)
    w_slab = w_slab.at[0:img_dim, 0:d1].set(w1)
    w_slab = w_slab.at[o2:o2 + d1, 0:d2].set(w2)
    w_slab = w_slab.at[o3:o3 + d2, 0:d3].set(w3)
    w_slab = w_slab.at[o4, 0:d3].set(w4[:, 0])       # row o4 = w4^T
    w_slab = w_slab.astype(jnp.bfloat16)

    v_slab = jnp.zeros((8, P), jnp.float32)
    v_slab = v_slab.at[0, 0:d1].set(g1[0])
    v_slab = v_slab.at[1, 0:d1].set(be1[0])
    v_slab = v_slab.at[2, 0:d2].set(g2[0])
    v_slab = v_slab.at[3, 0:d2].set(be2[0])
    v_slab = v_slab.at[4, 0:d3].set(g3[0])
    v_slab = v_slab.at[5, 0:d3].set(be3[0])

    b4_vec = b4.reshape(-1)                          # shape (1,) f32 for SMEM
    return w_slab, v_slab, b4_vec


# --------------------------------------------------------------------------- #
# References
# --------------------------------------------------------------------------- #
def _reference_pytorch_f32(x, params):
    """Faithful f32 reference (all biases, two-pass variance)."""
    (w1, b1, g1, be1, w2, b2, g2, be2, w3, b3, g3, be3, w4, b4) = params

    def block(h, w, b, g, be):
        z = h @ w + b
        mu = jnp.mean(z, axis=0, keepdims=True)
        var = jnp.mean((z - mu) ** 2, axis=0, keepdims=True)
        zn = (z - mu) / jnp.sqrt(var + EPS) * g + be
        return jnp.where(zn > 0, zn, NEG_SLOPE * zn)

    h = block(x, w1, b1, g1, be1)
    h = block(h, w2, b2, g2, be2)
    h = block(h, w3, b3, g3, be3)
    return h @ w4 + b4


def _reference_kernel_math(x, w_slab, v_slab, b4, img_dim, hidden_dim):
    """Pure-JAX mirror of the exact kernel math (bf16 dots, folded BN)."""
    _, _, _, P, K1, K2, K3, o2, o3, o4, _ = _geometry(img_dim, hidden_dim)
    w, v = w_slab, v_slab

    def bn_lrelu(z, g, be):
        mu = jnp.mean(z, axis=0, keepdims=True)
        zc = z - mu
        var = jnp.mean(zc * zc, axis=0, keepdims=True)
        scale = g * lax.rsqrt(var + EPS)
        zn = zc * scale + be
        return jnp.maximum(zn, NEG_SLOPE * zn)

    xb = x.astype(jnp.bfloat16)
    if xb.shape[1] != K1:
        xb = jnp.pad(xb, ((0, 0), (0, K1 - xb.shape[1])))

    z = jnp.dot(xb, w[0:K1, :], preferred_element_type=jnp.float32)
    h = bn_lrelu(z, v[0:1, :], v[1:2, :])
    z = jnp.dot(h[:, :K2].astype(jnp.bfloat16), w[o2:o2 + K2, :],
                preferred_element_type=jnp.float32)
    h = bn_lrelu(z, v[2:3, :], v[3:4, :])
    z = jnp.dot(h[:, :K3].astype(jnp.bfloat16), w[o3:o3 + K3, :],
                preferred_element_type=jnp.float32)
    h = bn_lrelu(z, v[4:5, :], v[5:6, :])
    out = lax.dot_general(w[o4:o4 + 16, :], h.astype(jnp.bfloat16),
                          dimension_numbers=(((1,), (1,)), ((), ())),
                          preferred_element_type=jnp.float32) + b4[0]
    return out[0].reshape(-1, 1)


# --------------------------------------------------------------------------- #
if __name__ == "__main__":
    # Small model (64 -> 128 -> 64 -> 32 -> 1); batch of 256 rows so the MXU
    # rows are occupied; everything still fits comfortably in VMEM.
    B, IMG_DIM, HIDDEN_DIM = 256, 64, 32

    key = jax.random.PRNGKey(0)
    kx, kp = jax.random.split(key)
    x_f32 = jax.random.normal(kx, (B, IMG_DIM), jnp.float32)
    x = x_f32.astype(jnp.bfloat16)            # bf16 at the kernel boundary
    params = init_params(kp, IMG_DIM, HIDDEN_DIM)
    w_slab, v_slab, b4 = pack_params(params, IMG_DIM, HIDDEN_DIM)

    out = discriminator_forward(x, w_slab, v_slab, b4,
                                img_dim=IMG_DIM, hidden_dim=HIDDEN_DIM)
    out = jax.block_until_ready(out)
    assert out.shape == (B, 1)

    # Second call hits the jit cache (no retrace / pallas_call rebuild).
    out2 = jax.block_until_ready(
        discriminator_forward(x, w_slab, v_slab, b4,
                              img_dim=IMG_DIM, hidden_dim=HIDDEN_DIM))
    assert jnp.allclose(out, out2)

    # Strict check against a pure-JAX mirror of the kernel math.
    ref_same = _reference_kernel_math(x, w_slab, v_slab, b4,
                                      IMG_DIM, HIDDEN_DIM)
    assert jnp.allclose(out, ref_same, atol=2e-3, rtol=2e-3), \
        "mismatch vs same-math JAX reference"

    # Loose check against the PyTorch-faithful f32 reference (only deviations:
    # bf16 MXU operands / bf16 input and dropping the BN-cancelled biases).
    ref_f32 = _reference_pytorch_f32(x_f32, params)
    assert float(jnp.max(jnp.abs(out - ref_f32))) < 0.15, \
        "drift vs f32 PyTorch-faithful reference too large"

    print("KERNEL_OK")
</pallas_src>

<mosaic_0001>
module attributes {stable_mosaic.version = 11 : i64} {
  func.func @kernel(%arg0: memref<256x64xbf16, #tpu.memory_space<vmem>>, %arg1: memref<272x128xbf16, #tpu.memory_space<vmem>>, %arg2: memref<8x128xf32, #tpu.memory_space<vmem>>, %arg3: memref<1xf32, #tpu.memory_space<smem>>, %arg4: memref<16x256xf32, #tpu.memory_space<vmem>>) attributes {dimension_semantics = [], scalar_prefetch = 0 : i64, scratch_operands = 0 : i64, tpu.core_type = #tpu.core_type<tc>} {
    %c0 = arith.constant 0 : index
    %c0_0 = arith.constant 0 : index
    %0 = vector.load %arg2[%c0, %c0_0] : memref<8x128xf32, #tpu.memory_space<vmem>>, vector<8x128xf32>
    %c0_1 = arith.constant 0 : index
    %c0_2 = arith.constant 0 : index
    %1 = vector.load %arg0[%c0_1, %c0_2] : memref<256x64xbf16, #tpu.memory_space<vmem>>, vector<256x64xbf16>
    %c0_3 = arith.constant 0 : index
    %c0_4 = arith.constant 0 : index
    %2 = vector.load %arg1[%c0_3, %c0_4] : memref<272x128xbf16, #tpu.memory_space<vmem>>, vector<64x128xbf16>
    %cst = arith.constant dense<0.000000e+00> : vector<256x128xf32>
    %3 = tpu.matmul %1, %2, %cst {dimension_numbers = #tpu.dot_dimension_numbers<[1], [0], [0], [1], [0, 0, 1, 1], [], []>} : vector<256x64xbf16>, vector<64x128xbf16>, vector<256x128xf32> -> vector<256x128xf32>
    %4 = vector.extract_strided_slice %0 {offsets = [0, 0], sizes = [1, 128], strides = [1, 1]} : vector<8x128xf32> to vector<1x128xf32>
    %5 = vector.extract_strided_slice %0 {offsets = [1, 0], sizes = [1, 128], strides = [1, 1]} : vector<8x128xf32> to vector<1x128xf32>
    %cst_5 = arith.constant dense<0.000000e+00> : vector<128xf32>
    %6 = vector.multi_reduction <add>, %3, %cst_5 [0] : vector<256x128xf32> to vector<128xf32>
    %7 = vector.shape_cast %6 : vector<128xf32> to vector<1x128xf32>
    %cst_6 = arith.constant 2.560000e+02 : f32
    %8 = vector.broadcast %cst_6 : f32 to vector<1x128xf32>
    %9 = arith.divf %7, %8 : vector<1x128xf32>
    %10 = vector.broadcast %9 : vector<1x128xf32> to vector<256x128xf32>
    %11 = arith.subf %3, %10 : vector<256x128xf32>
    %12 = arith.mulf %11, %11 : vector<256x128xf32>
    %cst_7 = arith.constant dense<0.000000e+00> : vector<128xf32>
    %13 = vector.multi_reduction <add>, %12, %cst_7 [0] : vector<256x128xf32> to vector<128xf32>
    %14 = vector.shape_cast %13 : vector<128xf32> to vector<1x128xf32>
    %cst_8 = arith.constant 2.560000e+02 : f32
    %15 = vector.broadcast %cst_8 : f32 to vector<1x128xf32>
    %16 = arith.divf %14, %15 : vector<1x128xf32>
    %cst_9 = arith.constant 9.99999974E-6 : f32
    %17 = vector.broadcast %cst_9 : f32 to vector<1x128xf32>
    %18 = arith.addf %16, %17 : vector<1x128xf32>
    %19 = math.rsqrt %18 : vector<1x128xf32>
    %20 = arith.mulf %4, %19 : vector<1x128xf32>
    %21 = vector.broadcast %20 : vector<1x128xf32> to vector<256x128xf32>
    %22 = arith.mulf %11, %21 : vector<256x128xf32>
    %23 = vector.broadcast %5 : vector<1x128xf32> to vector<256x128xf32>
    %24 = arith.addf %22, %23 : vector<256x128xf32>
    %cst_10 = arith.constant 2.000000e-01 : f32
    %25 = vector.broadcast %cst_10 : f32 to vector<256x128xf32>
    %26 = arith.mulf %25, %24 : vector<256x128xf32>
    %27 = arith.maximumf %24, %26 : vector<256x128xf32>
    %28 = arith.truncf %27 : vector<256x128xf32> to vector<256x128xbf16>
    %c64 = arith.constant 64 : index
    %c0_11 = arith.constant 0 : index
    %29 = vector.load %arg1[%c64, %c0_11] : memref<272x128xbf16, #tpu.memory_space<vmem>>, vector<128x128xbf16>
    %cst_12 = arith.constant dense<0.000000e+00> : vector<256x128xf32>
    %30 = tpu.matmul %28, %29, %cst_12 {dimension_numbers = #tpu.dot_dimension_numbers<[1], [0], [0], [1], [0, 0, 1, 1], [], []>} : vector<256x128xbf16>, vector<128x128xbf16>, vector<256x128xf32> -> vector<256x128xf32>
    %31 = vector.extract_strided_slice %0 {offsets = [2, 0], sizes = [1, 128], strides = [1, 1]} : vector<8x128xf32> to vector<1x128xf32>
    %32 = vector.extract_strided_slice %0 {offsets = [3, 0], sizes = [1, 128], strides = [1, 1]} : vector<8x128xf32> to vector<1x128xf32>
    %cst_13 = arith.constant dense<0.000000e+00> : vector<128xf32>
    %33 = vector.multi_reduction <add>, %30, %cst_13 [0] : vector<256x128xf32> to vector<128xf32>
    %34 = vector.shape_cast %33 : vector<128xf32> to vector<1x128xf32>
    %cst_14 = arith.constant 2.560000e+02 : f32
    %35 = vector.broadcast %cst_14 : f32 to vector<1x128xf32>
    %36 = arith.divf %34, %35 : vector<1x128xf32>
    %37 = vector.broadcast %36 : vector<1x128xf32> to vector<256x128xf32>
    %38 = arith.subf %30, %37 : vector<256x128xf32>
    %39 = arith.mulf %38, %38 : vector<256x128xf32>
    %cst_15 = arith.constant dense<0.000000e+00> : vector<128xf32>
    %40 = vector.multi_reduction <add>, %39, %cst_15 [0] : vector<256x128xf32> to vector<128xf32>
    %41 = vector.shape_cast %40 : vector<128xf32> to vector<1x128xf32>
    %cst_16 = arith.constant 2.560000e+02 : f32
    %42 = vector.broadcast %cst_16 : f32 to vector<1x128xf32>
    %43 = arith.divf %41, %42 : vector<1x128xf32>
    %cst_17 = arith.constant 9.99999974E-6 : f32
    %44 = vector.broadcast %cst_17 : f32 to vector<1x128xf32>
    %45 = arith.addf %43, %44 : vector<1x128xf32>
    %46 = math.rsqrt %45 : vector<1x128xf32>
    %47 = arith.mulf %31, %46 : vector<1x128xf32>
    %48 = vector.broadcast %47 : vector<1x128xf32> to vector<256x128xf32>
    %49 = arith.mulf %38, %48 : vector<256x128xf32>
    %50 = vector.broadcast %32 : vector<1x128xf32> to vector<256x128xf32>
    %51 = arith.addf %49, %50 : vector<256x128xf32>
    %cst_18 = arith.constant 2.000000e-01 : f32
    %52 = vector.broadcast %cst_18 : f32 to vector<256x128xf32>
    %53 = arith.mulf %52, %51 : vector<256x128xf32>
    %54 = arith.maximumf %51, %53 : vector<256x128xf32>
    %55 = vector.extract_strided_slice %54 {offsets = [0, 0], sizes = [256, 64], strides = [1, 1]} : vector<256x128xf32> to vector<256x64xf32>
    %56 = arith.truncf %55 : vector<256x64xf32> to vector<256x64xbf16>
    %c192 = arith.constant 192 : index
    %c0_19 = arith.constant 0 : index
    %57 = vector.load %arg1[%c192, %c0_19] : memref<272x128xbf16, #tpu.memory_space<vmem>>, vector<64x128xbf16>
    %cst_20 = arith.constant dense<0.000000e+00> : vector<256x128xf32>
    %58 = tpu.matmul %56, %57, %cst_20 {dimension_numbers = #tpu.dot_dimension_numbers<[1], [0], [0], [1], [0, 0, 1, 1], [], []>} : vector<256x64xbf16>, vector<64x128xbf16>, vector<256x128xf32> -> vector<256x128xf32>
    %59 = vector.extract_strided_slice %0 {offsets = [4, 0], sizes = [1, 128], strides = [1, 1]} : vector<8x128xf32> to vector<1x128xf32>
    %60 = vector.extract_strided_slice %0 {offsets = [5, 0], sizes = [1, 128], strides = [1, 1]} : vector<8x128xf32> to vector<1x128xf32>
    %cst_21 = arith.constant dense<0.000000e+00> : vector<128xf32>
    %61 = vector.multi_reduction <add>, %58, %cst_21 [0] : vector<256x128xf32> to vector<128xf32>
    %62 = vector.shape_cast %61 : vector<128xf32> to vector<1x128xf32>
    %cst_22 = arith.constant 2.560000e+02 : f32
    %63 = vector.broadcast %cst_22 : f32 to vector<1x128xf32>
    %64 = arith.divf %62, %63 : vector<1x128xf32>
    %65 = vector.broadcast %64 : vector<1x128xf32> to vector<256x128xf32>
    %66 = arith.subf %58, %65 : vector<256x128xf32>
    %67 = arith.mulf %66, %66 : vector<256x128xf32>
    %cst_23 = arith.constant dense<0.000000e+00> : vector<128xf32>
    %68 = vector.multi_reduction <add>, %67, %cst_23 [0] : vector<256x128xf32> to vector<128xf32>
    %69 = vector.shape_cast %68 : vector<128xf32> to vector<1x128xf32>
    %cst_24 = arith.constant 2.560000e+02 : f32
    %70 = vector.broadcast %cst_24 : f32 to vector<1x128xf32>
    %71 = arith.divf %69, %70 : vector<1x128xf32>
    %cst_25 = arith.constant 9.99999974E-6 : f32
    %72 = vector.broadcast %cst_25 : f32 to vector<1x128xf32>
    %73 = arith.addf %71, %72 : vector<1x128xf32>
    %74 = math.rsqrt %73 : vector<1x128xf32>
    %75 = arith.mulf %59, %74 : vector<1x128xf32>
    %76 = vector.broadcast %75 : vector<1x128xf32> to vector<256x128xf32>
    %77 = arith.mulf %66, %76 : vector<256x128xf32>
    %78 = vector.broadcast %60 : vector<1x128xf32> to vector<256x128xf32>
    %79 = arith.addf %77, %78 : vector<256x128xf32>
    %cst_26 = arith.constant 2.000000e-01 : f32
    %80 = vector.broadcast %cst_26 : f32 to vector<256x128xf32>
    %81 = arith.mulf %80, %79 : vector<256x128xf32>
    %82 = arith.maximumf %79, %81 : vector<256x128xf32>
    %c256 = arith.constant 256 : index
    %c0_27 = arith.constant 0 : index
    %83 = vector.load %arg1[%c256, %c0_27] : memref<272x128xbf16, #tpu.memory_space<vmem>>, vector<16x128xbf16>
    %84 = arith.truncf %82 : vector<256x128xf32> to vector<256x128xbf16>
    %cst_28 = arith.constant dense<0.000000e+00> : vector<16x256xf32>
    %85 = tpu.matmul %83, %84, %cst_28 {dimension_numbers = #tpu.dot_dimension_numbers<[1], [1], [0], [0], [0, 0, 1, 0], [], []>} : vector<16x128xbf16>, vector<256x128xbf16>, vector<16x256xf32> -> vector<16x256xf32>
    %c0_29 = arith.constant 0 : index
    %86 = memref.load %arg3[%c0_29] : memref<1xf32, #tpu.memory_space<smem>>
    %87 = vector.broadcast %86 : f32 to vector<16x256xf32>
    %88 = arith.addf %85, %87 : vector<16x256xf32>
    %c0_30 = arith.constant 0 : index
    %c0_31 = arith.constant 0 : index
    %89 = vector.load %arg4[%c0_30, %c0_31] : memref<16x256xf32, #tpu.memory_space<vmem>>, vector<16x256xf32>
    tpu.vector_store %arg4[%c0_30, %c0_31], %88 {strides = array<i32>} : memref<16x256xf32, #tpu.memory_space<vmem>>, vector<16x256xf32>,
    return
  }
}

</mosaic_0001>

<bundles_post_ra>
// kernel: discriminator_forward.1
= control target key start
LH: loop header
LB: loop body
LE: loop exit
PB: predicated region body
PF: predicated region fallthrough
CT: control target
= control target key end

     0   :  { %vm164_vm0 = vcmask 523264   ;;  %s3193_s1 = inlined_call_operand.vmem [shape: bf16[272,128], index: 1, kind: input, shape index: {}]   ;;  %s3194_s0 = inlined_call_operand.vmem [shape: bf16[256,64], index: 0, kind: input, shape index: {}]   ;;  %s3195_s2 = inlined_call_operand.vmem [shape: f32[8,128], index: 2, kind: input, shape index: {}]   ;;  %s3196_s3 = inlined_call_operand.<no memory space> [shape: f32[1], index: 3, kind: input, shape index: {}]   ;;  %s3197_s4 = inlined_call_operand.vmem [shape: f32[16,256], index: 4, kind: output, shape index: {}]  }
   0x1   :  { %v2070_v0 = vld [vmem:[%s3193_s1] sm:$0xff]   ;;  %v2071_v1 = vld [vmem:[%s3193_s1 + $0x8] sm:$0xff]   ;;  %v2072_v2 = vld [vmem:[%s3193_s1 + $0x10] sm:$0xff]  }
   0x2   :  { %1934 = vmatprep.subr.bf16.mxu0 %v2070_v0  ;;  %2062 = vmatprep.subr.bf16.mxu1 %v2070_v0  ;;  %v2074_v3 = vld [vmem:[%s3194_s0] sm:$0xff]   ;;  %v2073_v4 = vld [vmem:[%s3193_s1 + $0x18] sm:$0xff]   ;;  %v2075_v5 = vld [vmem:[%s3194_s0 + $0x8] sm:$0xff]  }
   0x3   :  { %1935 = vmatpush3.bf16.msra.mxu0 %v2070_v0  ;;  %2066 = vmatpush3.bf16.msra.mxu1 %v2070_v0  ;;  %v2082_v6 = vld [vmem:[%s3194_s0 + $0x40] sm:$0xff]   ;;  %v2076_v7 = vld [vmem:[%s3194_s0 + $0x10] sm:$0xff]   ;;  %v2083_v8 = vld [vmem:[%s3194_s0 + $0x48] sm:$0xff]  }
   0x4   :  { %1936 = vmatprep.subr.bf16.mxu0 %v2071_v1  ;;  %2063 = vmatprep.subr.bf16.mxu1 %v2071_v1  ;;  %v2084_v9 = vld [vmem:[%s3194_s0 + $0x50] sm:$0xff]   ;;  %v2077_v10 = vld [vmem:[%s3194_s0 + $0x18] sm:$0xff]   ;;  %v2078_v12 = vld [vmem:[%s3194_s0 + $0x20] sm:$0xff]  }
   0x5   :  { %1942 = vmatprep.mubr.msk.bf16.mxu0 %vm164_vm0, %v2074_v3  ;;  %1958 = vmatprep.mubr.msk.bf16.mxu1 %vm164_vm0, %v2082_v6  ;;  %v2085_v11 = vld [vmem:[%s3194_s0 + $0x58] sm:$0xff]   ;;  %v2086_v13 = vld [vmem:[%s3194_s0 + $0x60] sm:$0xff]   ;;  %v2079_v14 = vld [vmem:[%s3194_s0 + $0x28] sm:$0xff]  }
   0x6   :  { %v2087_v15 = vld [vmem:[%s3194_s0 + $0x68] sm:$0xff]   ;;  %v2080_v16 = vld [vmem:[%s3194_s0 + $0x30] sm:$0xff]   ;;  %v2081_v18 = vld [vmem:[%s3194_s0 + $0x38] sm:$0xff]  }
   0x7   :  { %1937 = vmatpush3.bf16.msra.mxu0 %v2071_v1  ;;  %2067 = vmatpush3.bf16.msra.mxu1 %v2071_v1  ;;  %v2088_v17 = vld [vmem:[%s3194_s0 + $0x70] sm:$0xff]   ;;  %v2089_v19 = vld [vmem:[%s3194_s0 + $0x78] sm:$0xff]  }
   0x8   :  { %1938 = vmatprep.subr.bf16.mxu0 %v2072_v2  ;;  %2064 = vmatprep.subr.bf16.mxu1 %v2072_v2 }
   0xb   :  { %1939 = vmatpush3.bf16.msra.mxu0 %v2072_v2  ;;  %2068 = vmatpush3.bf16.msra.mxu1 %v2072_v2 }
   0xc   :  { %1940 = vmatprep.subr.bf16.mxu0 %v2073_v4  ;;  %2065 = vmatprep.subr.bf16.mxu1 %v2073_v4 }
   0xf   :  { %1941 = vmatpush3.bf16.msra.mxu0 %v2073_v4  ;;  %2069 = vmatpush3.bf16.msra.mxu1 %v2073_v4 }
  0x12   :  { %1943 = vmatmul.mubr.msk.bf16.vlgmr.msra.gmra.mrb[0].mxu0 %vm164_vm0, %v2075_v5  ;;  %1959 = vmatmul.mubr.msk.bf16.vlgmr.msra.gmra.mrb[0].mxu1 %vm164_vm0, %v2083_v8 }
  0x13   :  { %1946 = vmatprep.mubr.msk.bf16.mxu0 %vm164_vm0, %v2076_v7  ;;  %1962 = vmatprep.mubr.msk.bf16.mxu1 %vm164_vm0, %v2084_v9 }
  0x1a   :  { %1947 = vmatmul.mubr.msk.bf16.gmra.mrb[4].mxu0 %vm164_vm0, %v2077_v10  ;;  %1963 = vmatmul.mubr.msk.bf16.gmra.mrb[4].mxu1 %vm164_vm0, %v2085_v11 }
  0x1b   :  { %1950 = vmatprep.mubr.msk.bf16.mxu0 %vm164_vm0, %v2078_v12  ;;  %1966 = vmatprep.mubr.msk.bf16.mxu1 %vm164_vm0, %v2086_v13 }
  0x22   :  { %1951 = vmatmul.mubr.msk.bf16.gmra.mrb[8].mxu0 %vm164_vm0, %v2079_v14  ;;  %1967 = vmatmul.mubr.msk.bf16.gmra.mrb[8].mxu1 %vm164_vm0, %v2087_v15 }
  0x23   :  { %1954 = vmatprep.mubr.msk.bf16.mxu0 %vm164_vm0, %v2080_v16  ;;  %1970 = vmatprep.mubr.msk.bf16.mxu1 %vm164_vm0, %v2088_v17  ;;  %v2090_v17 = vld [vmem:[%s3193_s1 + $0x20] sm:$0xff]  }
  0x24   :  { %1974 = vmatprep.subr.bf16.mxu1 %v2090_v17 }
  0x25   :  { %1975 = vmatpush3.bf16.msra.mxu1 %v2090_v17 }
  0x2a   :  { %1955 = vmatmul.mubr.msk.bf16.gmra.mrb[12].mxu0 %vm164_vm0, %v2081_v18  ;;  %1971 = vmatmul.mubr.msk.bf16.gmra.mrb[12].mxu1 %vm164_vm0, %v2089_v19 }
  0xe5   :  { %v2211_v20 = vpop.f32.mrb[0].mxu0  ;;  %v2213_v21 = vpop.f32.mrb[0].mxu1 }
  0xe6   :  { %v2215_v22 = vpop.f32.mrb[1].mxu0  ;;  %v2217_v23 = vpop.f32.mrb[1].mxu1 }
  0xe7   :  { %v2219_v24 = vpop.f32.mrb[2].mxu0  ;;  %v2221_v25 = vpop.f32.mrb[2].mxu1 }
  0xe8   :  { %v2223_v26 = vpop.f32.mrb[3].mxu0  ;;  %v2225_v27 = vpop.f32.mrb[3].mxu1 }
  0xe9   :  { %v374_v28 = vadd.f32 %v2223_v26, %v2215_v22 }
  0xeb   :  { %v375_v29 = vadd.f32 %v2211_v20, %v374_v28  ;;  %v2091_v28 = vld [vmem:[%s3193_s1 + $0x28] sm:$0xff]  }
  0xec   :  { %1976 = vmatprep.subr.bf16.mxu1 %v2091_v28 }
  0xed   :  { %v2230_v30 = vpop.f32.mrb[4].mxu0  ;;  %v376_v31 = vadd.f32 %v2219_v24, %v375_v29  ;;  %v2233_v32 = vpop.f32.mrb[4].mxu1  ;;  %1977 = vmatpush3.bf16.msra.mxu1 %v2091_v28 }
  0xee   :  { %v2235_v33 = vpop.f32.mrb[5].mxu0  ;;  %v2237_v34 = vpop.f32.mrb[5].mxu1 }
  0xef   :  { %v377_v35 = vadd.f32 %v376_v31, %v2235_v33  ;;  %v2240_v36 = vpop.f32.mrb[6].mxu0  ;;  %v2242_v37 = vpop.f32.mrb[6].mxu1 }
  0xf0   :  { %v2244_v38 = vpop.f32.mrb[7].mxu0  ;;  %v2246_v39 = vpop.f32.mrb[7].mxu1 }
  0xf1   :  { %v378_v40 = vadd.f32 %v377_v35, %v2244_v38  ;;  %v2092_v35 = vld [vmem:[%s3193_s1 + $0x30] sm:$0xff]  }
  0xf2   :  { %1978 = vmatprep.subr.bf16.mxu1 %v2092_v35 }
  0xf3   :  { %v379_v41 = vadd.f32 %v2230_v30, %v378_v40  ;;  %1979 = vmatpush3.bf16.msra.mxu1 %v2092_v35 }
  0xf5   :  { %v2250_v42 = vpop.f32.mrb[8].mxu0  ;;  %v380_v43 = vadd.f32 %v2240_v36, %v379_v41  ;;  %v2253_v44 = vpop.f32.mrb[8].mxu1 }
  0xf6   :  { %v2255_v45 = vpop.f32.mrb[9].mxu0  ;;  %v2257_v46 = vpop.f32.mrb[9].mxu1 }
  0xf7   :  { %v381_v47 = vadd.f32 %v380_v43, %v2255_v45  ;;  %v2260_v48 = vpop.f32.mrb[10].mxu0  ;;  %v2262_v49 = vpop.f32.mrb[10].mxu1  ;;  %v2093_v43 = vld [vmem:[%s3193_s1 + $0x38] sm:$0xff]  }
  0xf8   :  { %v2264_v50 = vpop.f32.mrb[11].mxu0  ;;  %v2266_v51 = vpop.f32.mrb[11].mxu1  ;;  %1980 = vmatprep.subr.bf16.mxu1 %v2093_v43 }
  0xf9   :  { %v382_v52 = vadd.f32 %v381_v47, %v2264_v50  ;;  %1981 = vmatpush3.bf16.msra.mxu1 %v2093_v43 }
  0xfb   :  { %v383_v53 = vadd.f32 %v2250_v42, %v382_v52 }
  0xfd   :  { %v2270_v54 = vpop.f32.mrb[12].mxu0  ;;  %v384_v55 = vadd.f32 %v2260_v48, %v383_v53  ;;  %v2273_v56 = vpop.f32.mrb[12].mxu1  ;;  %v2094_v53 = vld [vmem:[%s3193_s1 + $0x40] sm:$0xff]  }
  0xfe   :  { %v295_v57 = vpop.f32.mrb[13].mxu0  ;;  %v2275_v58 = vpop.f32.mrb[13].mxu1  ;;  %1982 = vmatprep.subr.bf16.mxu1 %v2094_v53 }
  0xff   :  { %v385_v59 = vadd.f32 %v384_v55, %v295_v57  ;;  %v1957_v60 = vpop.f32.mrb[14].mxu0  ;;  %v2277_v61 = vpop.f32.mrb[14].mxu1  ;;  %1983 = vmatpush3.bf16.msra.mxu1 %v2094_v53 }
 0x100   :  { %v298_v62 = vpop.f32.mrb[15].mxu0  ;;  %v2279_v63 = vpop.f32.mrb[15].mxu1 }
 0x101   :  { %v386_v0 = vadd.f32 %v385_v59, %v298_v62 }
 0x103   :  { %v387_v1 = vadd.f32 %v2270_v54, %v386_v0 }
 0x105   :  { %v388_v2 = vadd.f32 %v1957_v60, %v387_v1 }
 0x107   :  { %v389_v3 = vadd.f32 %v388_v2, %v2217_v23 }
 0x109   :  { %v390_v4 = vadd.f32 %v389_v3, %v2225_v27  ;;  %v2095_v3 = vld [vmem:[%s3193_s1 + $0x48] sm:$0xff]  }
 0x10a   :  { %1984 = vmatprep.subr.bf16.mxu1 %v2095_v3 }
 0x10b   :  { %v391_v5 = vadd.f32 %v2213_v21, %v390_v4  ;;  %1985 = vmatpush3.bf16.msra.mxu1 %v2095_v3 }
 0x10d   :  { %v392_v6 = vadd.f32 %v2221_v25, %v391_v5 }
 0x10f   :  { %v393_v7 = vadd.f32 %v392_v6, %v2237_v34 }
 0x111   :  { %v394_v8 = vadd.f32 %v393_v7, %v2246_v39 }
 0x113   :  { %v395_v9 = vadd.f32 %v2233_v32, %v394_v8 }
 0x115   :  { %v396_v10 = vadd.f32 %v2242_v37, %v395_v9 }
 0x117   :  { %v397_v11 = vadd.f32 %v396_v10, %v2257_v46 }
 0x119   :  { %v398_v12 = vadd.f32 %v397_v11, %v2266_v51 }
 0x11b   :  { %v399_v13 = vadd.f32 %v2253_v44, %v398_v12 }
 0x11d   :  { %v400_v14 = vadd.f32 %v2262_v49, %v399_v13 }
 0x11f   :  { %v401_v15 = vadd.f32 %v400_v14, %v2275_v58 }
 0x121   :  { %v402_v16 = vadd.f32 %v401_v15, %v2279_v63 }
 0x123   :  { %v403_v18 = vadd.f32 %v2273_v56, %v402_v16 }
 0x125   :  { %v404_v19 = vadd.f32 %v2277_v61, %v403_v18 }
 0x127   :  { %v405_v29 = vrot.slane %v404_v19, 4 }
 0x129   :  { %v406_v31 = vadd.f32 %v405_v29, %v404_v19 }
 0x12b   :  { %v407_v40 = vrot.slane %v406_v31, 2 }
 0x12d   :  { %v408_v41 = vadd.f32 %v407_v40, %v406_v31 }
 0x12f   :  { %v409_v47 = vrot.slane %v408_v41, 1 }
 0x131   :  { %v410_v52 = vadd.f32 %v409_v47, %v408_v41 }
 0x133   :  { %v412_v55 = vmul.f32 0.00390625, %v410_v52 }
 0x135   :  { %v2314_v59 = vsub.f32 %v2215_v22, %v412_v55  ;;  %v2317_v0 = vsub.f32 %v2223_v26, %v412_v55  ;;  %v2320_v1 = vsub.f32 %v2211_v20, %v412_v55  ;;  %v2323_v2 = vsub.f32 %v2219_v24, %v412_v55 }
 0x136   :  { %v2329_v4 = vsub.f32 %v2235_v33, %v412_v55  ;;  %v2332_v5 = vsub.f32 %v2244_v38, %v412_v55  ;;  %v2335_v22 = vsub.f32 %v2230_v30, %v412_v55  ;;  %v2338_v26 = vsub.f32 %v2240_v36, %v412_v55 }
 0x137   :  { %v2341_v20 = vsub.f32 %v2255_v45, %v412_v55  ;;  %v2344_v24 = vsub.f32 %v2264_v50, %v412_v55  ;;  %v2347_v6 = vsub.f32 %v2250_v42, %v412_v55  ;;  %v2350_v33 = vsub.f32 %v2260_v48, %v412_v55 }
 0x138   :  { %v2352_v38 = vsub.f32 %v295_v57, %v412_v55  ;;  %v2354_v30 = vsub.f32 %v298_v62, %v412_v55  ;;  %v2357_v36 = vsub.f32 %v2270_v54, %v412_v55  ;;  %v2359_v7 = vsub.f32 %v1957_v60, %v412_v55  ;;  %v2096_v54 = vld [vmem:[%s3193_s1 + $0x50] sm:$0xff]  }
 0x139   :  { %v2362_v45 = vsub.f32 %v2217_v23, %v412_v55  ;;  %v2365_v42 = vsub.f32 %v2225_v27, %v412_v55  ;;  %v2368_v48 = vsub.f32 %v2213_v21, %v412_v55  ;;  %v2371_v50 = vsub.f32 %v2221_v25, %v412_v55  ;;  %1986 = vmatprep.subr.bf16.mxu1 %v2096_v54 }
 0x13a   :  { %v2377_v57 = vsub.f32 %v2237_v34, %v412_v55  ;;  %v2380_v60 = vsub.f32 %v2246_v39, %v412_v55  ;;  %v2383_v23 = vsub.f32 %v2233_v32, %v412_v55  ;;  %v2386_v27 = vsub.f32 %v2242_v37, %v412_v55  ;;  %1987 = vmatpush3.bf16.msra.mxu1 %v2096_v54 }
 0x13b   :  { %v2389_v21 = vsub.f32 %v2257_v46, %v412_v55  ;;  %v2392_v25 = vsub.f32 %v2266_v51, %v412_v55  ;;  %v2395_v62 = vsub.f32 %v2253_v44, %v412_v55  ;;  %v2398_v34 = vsub.f32 %v2262_v49, %v412_v55  ;;  %v2097_v44 = vld [vmem:[%s3193_s1 + $0x58] sm:$0xff]  }
 0x13c   :  { %v2401_v39 = vsub.f32 %v2275_v58, %v412_v55  ;;  %v2404_v32 = vsub.f32 %v2279_v63, %v412_v55  ;;  %v2407_v37 = vsub.f32 %v2273_v56, %v412_v55  ;;  %v2410_v46 = vsub.f32 %v2277_v61, %v412_v55  ;;  %1988 = vmatprep.subr.bf16.mxu1 %v2097_v44 }
 0x13d   :  { %v445_v49 = vmul.f32 %v2314_v59, %v2314_v59  ;;  %v446_v51 = vmul.f32 %v2317_v0, %v2317_v0  ;;  %v447_v56 = vmul.f32 %v2320_v1, %v2320_v1  ;;  %v448_v61 = vmul.f32 %v2323_v2, %v2323_v2 }
 0x13e   :  { %1989 = vmatpush3.bf16.msra.mxu1 %v2097_v44  ;;  %v449_v8 = vmul.f32 %v2329_v4, %v2329_v4  ;;  %v450_v10 = vmul.f32 %v2332_v5, %v2332_v5  ;;  %v451_v12 = vmul.f32 %v2335_v22, %v2335_v22  ;;  %v452_v14 = vmul.f32 %v2338_v26, %v2338_v26 }
 0x13f   :  { %v477_v58 = vadd.f32 %v446_v51, %v445_v49  ;;  %v453_v16 = vmul.f32 %v2341_v20, %v2341_v20  ;;  %v454_v18 = vmul.f32 %v2344_v24, %v2344_v24  ;;  %v455_v28 = vmul.f32 %v2347_v6, %v2347_v6 }
 0x140   :  { %v456_v31 = vmul.f32 %v2350_v33, %v2350_v33  ;;  %v457_v40 = vmul.f32 %v2352_v38, %v2352_v38  ;;  %v458_v43 = vmul.f32 %v2354_v30, %v2354_v30  ;;  %v459_v52 = vmul.f32 %v2357_v36, %v2357_v36 }
 0x141   :  { %v478_v63 = vadd.f32 %v477_v58, %v447_v56  ;;  %v460_v55 = vmul.f32 %v2359_v7, %v2359_v7  ;;  %v461_v54 = vmul.f32 %v2362_v45, %v2362_v45  ;;  %v462_v49 = vmul.f32 %v2365_v42, %v2365_v42 }
 0x142   :  { %v463_v56 = vmul.f32 %v2368_v48, %v2368_v48 }
 0x143   :  { %v479_v9 = vadd.f32 %v478_v63, %v448_v61  ;;  %v464_v61 = vmul.f32 %v2371_v50, %v2371_v50 }
 0x145   :  { %v480_v11 = vadd.f32 %v479_v9, %v449_v8  ;;  %v465_v8 = vmul.f32 %v2377_v57, %v2377_v57 }
 0x147   :  { %v481_v13 = vadd.f32 %v480_v11, %v450_v10  ;;  %v466_v10 = vmul.f32 %v2380_v60, %v2380_v60 }
 0x149   :  { %v482_v15 = vadd.f32 %v481_v13, %v451_v12  ;;  %v467_v12 = vmul.f32 %v2383_v23, %v2383_v23 }
 0x14b   :  { %v483_v17 = vadd.f32 %v482_v15, %v452_v14  ;;  %v468_v14 = vmul.f32 %v2386_v27, %v2386_v27 }
 0x14d   :  { %v484_v19 = vadd.f32 %v483_v17, %v453_v16  ;;  %v469_v16 = vmul.f32 %v2389_v21, %v2389_v21 }
 0x14f   :  { %v485_v29 = vadd.f32 %v484_v19, %v454_v18  ;;  %v470_v18 = vmul.f32 %v2392_v25, %v2392_v25 }
 0x151   :  { %v486_v35 = vadd.f32 %v485_v29, %v455_v28  ;;  %v471_v28 = vmul.f32 %v2395_v62, %v2395_v62 }
 0x153   :  { %v487_v41 = vadd.f32 %v486_v35, %v456_v31  ;;  %v472_v31 = vmul.f32 %v2398_v34, %v2398_v34 }
 0x155   :  { %v488_v47 = vadd.f32 %v487_v41, %v457_v40  ;;  %v473_v40 = vmul.f32 %v2401_v39, %v2401_v39 }
 0x157   :  { %v489_v53 = vadd.f32 %v488_v47, %v458_v43  ;;  %v474_v43 = vmul.f32 %v2404_v32, %v2404_v32 }
 0x159   :  { %v490_v3 = vadd.f32 %v489_v53, %v459_v52  ;;  %v475_v52 = vmul.f32 %v2407_v37, %v2407_v37 }
 0x15b   :  { %v491_v44 = vadd.f32 %v490_v3, %v460_v55  ;;  %v476_v55 = vmul.f32 %v2410_v46, %v2410_v46 }
 0x15d   :  { %v492_v51 = vadd.f32 %v491_v44, %v461_v54 }
 0x15f   :  { %v493_v58 = vadd.f32 %v492_v51, %v462_v49 }
 0x161   :  { %v494_v63 = vadd.f32 %v493_v58, %v463_v56 }
 0x163   :  { %v495_v9 = vadd.f32 %v494_v63, %v464_v61 }
 0x165   :  { %v496_v11 = vadd.f32 %v495_v9, %v465_v8  ;;  %v518_v9 = vlaneseq }
 0x167   :  { %v497_v13 = vadd.f32 %v496_v11, %v466_v10  ;;  %v2479_v10 = vshrl.u32 %v518_v9, 7 }
 0x169   :  { %v498_v15 = vadd.f32 %v497_v13, %v467_v12  ;;  %v2484_v12 = vld [vmem:[%s3195_s2] sm:$0xff] }
 0x16b   :  { %v499_v17 = vadd.f32 %v498_v15, %v468_v14  ;;  %v520_v14 = vsub.s32 0, %v2479_v10 }
 0x16d   :  { %v500_v19 = vadd.f32 %v499_v17, %v469_v16  ;;  %v556_v16 = vsub.s32 1, %v2479_v10 }
 0x16f   :  { %v501_v29 = vadd.f32 %v500_v19, %v470_v18  ;;  %v2492_v17 = vrot.slane %v2484_v12, %v556_v16 }
 0x171   :  { %v502_v35 = vadd.f32 %v501_v29, %v471_v28 }
 0x173   :  { %v503_v41 = vadd.f32 %v502_v35, %v472_v31 }
 0x175   :  { %v504_v47 = vadd.f32 %v503_v41, %v473_v40 }
 0x177   :  { %v505_v53 = vadd.f32 %v504_v47, %v474_v43 }
 0x179   :  { %v506_v3 = vadd.f32 %v505_v53, %v475_v52 }
 0x17b   :  { %v507_v54 = vadd.f32 %v506_v3, %v476_v55 }
 0x17d   :  { %v508_v44 = vrot.slane %v507_v54, 4 }
 0x17f   :  { %v509_v49 = vadd.f32 %v508_v44, %v507_v54 }
 0x181   :  { %v510_v51 = vrot.slane %v509_v49, 2 }
 0x183   :  { %v511_v56 = vadd.f32 %v510_v51, %v509_v49 }
 0x185   :  { %v512_v58 = vrot.slane %v511_v56, 1 }
 0x187   :  { %v513_v61 = vadd.f32 %v512_v58, %v511_v56 }
 0x189   :  { %v514_v63 = vmul.f32 0.00390625, %v513_v61 }
 0x18b   :  { %v515_v8 = vadd.f32 1e-05, %v514_v63 }
 0x18d   :  { %2103 = vrsqrt.f32 %v515_v8 }
 0x197   :  { %v2104_v11 = vpop.eup %2103 }
 0x198   :  { %v517_v13 = vmul.f32 %v2104_v11, %v2484_v12 }
 0x19a   :  { %v2488_v15 = vrot.slane %v517_v13, %v520_v14 }
 0x19c   :  { %v522_v18 = vmul.f32 %v2488_v15, %v2314_v59  ;;  %v524_v19 = vmul.f32 %v2488_v15, %v2320_v1  ;;  %v525_v28 = vmul.f32 %v2488_v15, %v2323_v2  ;;  %v523_v29 = vmul.f32 %v2488_v15, %v2317_v0 }
 0x19d   :  { %v526_v31 = vmul.f32 %v2488_v15, %v2329_v4  ;;  %v527_v41 = vmul.f32 %v2488_v15, %v2332_v5  ;;  %v528_v0 = vmul.f32 %v2488_v15, %v2335_v22  ;;  %v529_v4 = vmul.f32 %v2488_v15, %v2338_v26 }
 0x19e   :  { %v558_v35 = vadd.f32 %v2492_v17, %v522_v18  ;;  %v560_v40 = vadd.f32 %v2492_v17, %v524_v19  ;;  %v561_v59 = vadd.f32 %v2492_v17, %v525_v28  ;;  %v559_v1 = vadd.f32 %v2492_v17, %v523_v29 }
 0x19f   :  { %v562_v43 = vadd.f32 %v2492_v17, %v526_v31  ;;  %v563_v52 = vadd.f32 %v2492_v17, %v527_v41  ;;  %v530_v5 = vmul.f32 %v2488_v15, %v2341_v20  ;;  %v531_v55 = vmul.f32 %v2488_v15, %v2344_v24 }
 0x1a0   :  { %v590_v2 = vmul.f32 0.2, %v558_v35  ;;  %v592_v47 = vmul.f32 0.2, %v560_v40  ;;  %v593_v53 = vmul.f32 0.2, %v561_v59  ;;  %v564_v56 = vadd.f32 %v2492_v17, %v528_v0 }
 0x1a1   :  { %v591_v3 = vmul.f32 0.2, %v559_v1  ;;  %v594_v54 = vmul.f32 0.2, %v562_v43  ;;  %v565_v22 = vadd.f32 %v2492_v17, %v529_v4  ;;  %v595_v58 = vmul.f32 0.2, %v563_v52 }
 0x1a2   :  { %v624_v44 = vmax.f32 %v560_v40, %v592_v47  ;;  %v625_v49 = vmax.f32 %v561_v59, %v593_v53  ;;  %v622_v51 = vmax.f32 %v558_v35, %v590_v2  ;;  %v566_v26 = vadd.f32 %v2492_v17, %v530_v5 }
 0x1a3   :  { %v567_v61 = vadd.f32 %v2492_v17, %v531_v55  ;;  %v623_v63 = vmax.f32 %v559_v1, %v591_v3  ;;  %v626_v20 = vmax.f32 %v562_v43, %v594_v54  ;;  %v532_v24 = vmul.f32 %v2488_v15, %v2347_v6 }
 0x1a4   :  { %v655_v8 = vpack.c.bf16 %v625_v49, %v624_v44  ;;  %v533_v11 = vmul.f32 %v2488_v15, %v2350_v33  ;;  %v596_v13 = vmul.f32 0.2, %v564_v56  ;;  %v597_v14 = vmul.f32 0.2, %v565_v22 }
 0x1a5   :  { %v654_v9 = vpack.c.bf16 %v623_v63, %v622_v51  ;;  %v627_v16 = vmax.f32 %v563_v52, %v595_v58  ;;  %v534_v18 = vmul.f32 %v2488_v15, %v2352_v38  ;;  %v535_v19 = vmul.f32 %v2488_v15, %v2354_v30 }
 0x1a6   :  { %v598_v28 = vmul.f32 0.2, %v566_v26  ;;  %v599_v29 = vmul.f32 0.2, %v567_v61  ;;  %v568_v6 = vadd.f32 %v2492_v17, %v532_v24  ;;  %v569_v35 = vadd.f32 %v2492_v17, %v533_v11 }
 0x1a7   :  { %1990 = vmatprep.mubr.bf16.mxu1 %v654_v9  ;;  %v656_v31 = vpack.c.bf16 %v627_v16, %v626_v20  ;;  %v628_v33 = vmax.f32 %v564_v56, %v596_v13  ;;  %v629_v40 = vmax.f32 %v565_v22, %v597_v14  ;;  %v570_v41 = vadd.f32 %v2492_v17, %v534_v18 }
 0x1a8   :  { %1991 = vmatmul.mubr.bf16.vlgmr.msra.gmra.mrb[16].mxu1 %v655_v8  ;;  %v571_v59 = vadd.f32 %v2492_v17, %v535_v19  ;;  %v630_v38 = vmax.f32 %v566_v26, %v598_v28  ;;  %v631_v1 = vmax.f32 %v567_v61, %v599_v29  ;;  %v536_v30 = vmul.f32 %v2488_v15, %v2357_v36 }
 0x1a9   :  { %1994 = vmatprep.mubr.bf16.mxu1 %v656_v31  ;;  %v537_v43 = vmul.f32 %v2488_v15, %v2359_v7  ;;  %v538_v2 = vmul.f32 %v2488_v15, %v2362_v45  ;;  %v600_v47 = vmul.f32 0.2, %v568_v6  ;;  %v601_v0 = vmul.f32 0.2, %v569_v35 }
 0x1aa   :  { %v657_v4 = vpack.c.bf16 %v629_v40, %v628_v33  ;;  %v539_v52 = vmul.f32 %v2488_v15, %v2365_v42  ;;  %v602_v53 = vmul.f32 0.2, %v570_v41  ;;  %v603_v5 = vmul.f32 0.2, %v571_v59 }
 0x1ab   :  { %v658_v55 = vpack.c.bf16 %v631_v1, %v630_v38  ;;  %v572_v3 = vadd.f32 %v2492_v17, %v536_v30  ;;  %v573_v36 = vadd.f32 %v2492_v17, %v537_v43  ;;  %v632_v54 = vmax.f32 %v568_v6, %v600_v47 }
 0x1ac   :  { %v633_v7 = vmax.f32 %v569_v35, %v601_v0  ;;  %v574_v44 = vadd.f32 %v2492_v17, %v538_v2  ;;  %v575_v45 = vadd.f32 %v2492_v17, %v539_v52  ;;  %v634_v49 = vmax.f32 %v570_v41, %v602_v53 }
 0x1ad   :  { %v635_v51 = vmax.f32 %v571_v59, %v603_v5  ;;  %v540_v42 = vmul.f32 %v2488_v15, %v2368_v48  ;;  %v541_v56 = vmul.f32 %v2488_v15, %v2371_v50  ;;  %v542_v22 = vmul.f32 %v2488_v15, %v2377_v57 }
 0x1ae   :  { %v604_v58 = vmul.f32 0.2, %v572_v3  ;;  %v605_v26 = vmul.f32 0.2, %v573_v36  ;;  %v659_v61 = vpack.c.bf16 %v633_v7, %v632_v54  ;;  %v543_v63 = vmul.f32 %v2488_v15, %v2380_v60 }
 0x1af   :  { %v606_v8 = vmul.f32 0.2, %v574_v44  ;;  %v607_v20 = vmul.f32 0.2, %v575_v45  ;;  %v660_v24 = vpack.c.bf16 %v635_v51, %v634_v49  ;;  %v576_v9 = vadd.f32 %v2492_v17, %v540_v42 }
 0x1b0   :  { %1995 = vmatmul.mubr.bf16.gmra.mrb[20].mxu1 %v657_v4  ;;  %v577_v48 = vadd.f32 %v2492_v17, %v541_v56  ;;  %v636_v11 = vmax.f32 %v572_v3, %v604_v58  ;;  %v637_v50 = vmax.f32 %v573_v36, %v605_v26  ;;  %v578_v13 = vadd.f32 %v2492_v17, %v542_v22 }
 0x1b1   :  { %1998 = vmatprep.mubr.bf16.mxu1 %v658_v55  ;;  %v579_v57 = vadd.f32 %v2492_v17, %v543_v63  ;;  %v638_v14 = vmax.f32 %v574_v44, %v606_v8  ;;  %v639_v16 = vmax.f32 %v575_v45, %v607_v20  ;;  %v544_v60 = vmul.f32 %v2488_v15, %v2383_v23 }
 0x1b2   :  { %v545_v18 = vmul.f32 %v2488_v15, %v2386_v27  ;;  %v546_v19 = vmul.f32 %v2488_v15, %v2389_v21  ;;  %v608_v28 = vmul.f32 0.2, %v576_v9  ;;  %v609_v29 = vmul.f32 0.2, %v577_v48 }
 0x1b3   :  { %v661_v31 = vpack.c.bf16 %v637_v50, %v636_v11  ;;  %v547_v6 = vmul.f32 %v2488_v15, %v2392_v25  ;;  %v610_v35 = vmul.f32 0.2, %v578_v13  ;;  %v611_v33 = vmul.f32 0.2, %v579_v57 }
 0x1b4   :  { %v662_v40 = vpack.c.bf16 %v639_v16, %v638_v14  ;;  %v580_v41 = vadd.f32 %v2492_v17, %v544_v60  ;;  %v581_v23 = vadd.f32 %v2492_v17, %v545_v18  ;;  %v640_v59 = vmax.f32 %v576_v9, %v608_v28 }
 0x1b5   :  { %v641_v27 = vmax.f32 %v577_v48, %v609_v29  ;;  %v582_v38 = vadd.f32 %v2492_v17, %v546_v19  ;;  %v583_v21 = vadd.f32 %v2492_v17, %v547_v6  ;;  %v642_v1 = vmax.f32 %v578_v13, %v610_v35 }
 0x1b6   :  { %v643_v30 = vmax.f32 %v579_v57, %v611_v33  ;;  %v551_v25 = vmul.f32 %v2488_v15, %v2404_v32  ;;  %v548_v43 = vmul.f32 %v2488_v15, %v2395_v62  ;;  %v549_v2 = vmul.f32 %v2488_v15, %v2398_v34 }
 0x1b7   :  { %v612_v47 = vmul.f32 0.2, %v580_v41  ;;  %v613_v0 = vmul.f32 0.2, %v581_v23  ;;  %v663_v4 = vpack.c.bf16 %v641_v27, %v640_v59  ;;  %v550_v52 = vmul.f32 %v2488_v15, %v2401_v39 }
 0x1b8   :  { %1999 = vmatmul.mubr.bf16.gmra.mrb[24].mxu1 %v659_v61  ;;  %v614_v53 = vmul.f32 0.2, %v582_v38  ;;  %v615_v5 = vmul.f32 0.2, %v583_v21  ;;  %v664_v55 = vpack.c.bf16 %v643_v30, %v642_v1  ;;  %v584_v3 = vadd.f32 %v2492_v17, %v548_v43 }
 0x1b9   :  { %2002 = vmatprep.mubr.bf16.mxu1 %v660_v24  ;;  %v585_v32 = vadd.f32 %v2492_v17, %v549_v2  ;;  %v644_v36 = vmax.f32 %v580_v41, %v612_v47  ;;  %v645_v62 = vmax.f32 %v581_v23, %v613_v0  ;;  %v587_v54 = vadd.f32 %v2492_v17, %v551_v25 }
 0x1ba   :  { %v586_v34 = vadd.f32 %v2492_v17, %v550_v52  ;;  %v646_v7 = vmax.f32 %v582_v38, %v614_v53  ;;  %v647_v44 = vmax.f32 %v583_v21, %v615_v5  ;;  %v552_v39 = vmul.f32 %v2488_v15, %v2407_v37 }
 0x1bb   :  { %v553_v45 = vmul.f32 %v2488_v15, %v2410_v46  ;;  %v616_v49 = vmul.f32 0.2, %v584_v3  ;;  %v617_v51 = vmul.f32 0.2, %v585_v32  ;;  %v665_v42 = vpack.c.bf16 %v645_v62, %v644_v36 }
 0x1bc   :  { %v619_v56 = vmul.f32 0.2, %v587_v54  ;;  %v618_v22 = vmul.f32 0.2, %v586_v34  ;;  %v666_v58 = vpack.c.bf16 %v647_v44, %v646_v7  ;;  %v588_v26 = vadd.f32 %v2492_v17, %v552_v39 }
 0x1bd   :  { %v589_v61 = vadd.f32 %v2492_v17, %v553_v45  ;;  %v648_v63 = vmax.f32 %v584_v3, %v616_v49  ;;  %v649_v8 = vmax.f32 %v585_v32, %v617_v51 }
 0x1be   :  { %v650_v20 = vmax.f32 %v586_v34, %v618_v22  ;;  %v651_v24 = vmax.f32 %v587_v54, %v619_v56  ;;  %v620_v37 = vmul.f32 0.2, %v588_v26 }
 0x1bf   :  { %v621_v9 = vmul.f32 0.2, %v589_v61  ;;  %v667_v48 = vpack.c.bf16 %v649_v8, %v648_v63 }
 0x1c0   :  { %2003 = vmatmul.mubr.bf16.gmra.mrb[28].mxu1 %v661_v31  ;;  %v668_v46 = vpack.c.bf16 %v651_v24, %v650_v20  ;;  %v652_v15 = vmax.f32 %v588_v26, %v620_v37 }
 0x1c1   :  { %2006 = vmatprep.mubr.bf16.mxu1 %v662_v40  ;;  %v653_v11 = vmax.f32 %v589_v61, %v621_v9 }
 0x1c3   :  { %v669_v50 = vpack.c.bf16 %v653_v11, %v652_v15 }
 0x1c8   :  { %2007 = vmatmul.mubr.bf16.gmra.mrb[32].mxu1 %v663_v4 }
 0x1c9   :  { %2010 = vmatprep.mubr.bf16.mxu1 %v664_v55 }
 0x1d0   :  { %2011 = vmatmul.mubr.bf16.gmra.mrb[36].mxu1 %v665_v42 }
 0x1d1   :  { %2014 = vmatprep.mubr.bf16.mxu1 %v666_v58 }
 0x1d8   :  { %2015 = vmatmul.mubr.bf16.gmra.mrb[40].mxu1 %v667_v48 }
 0x1d9   :  { %2018 = vmatprep.mubr.bf16.mxu1 %v668_v46 }
 0x1e0   :  { %2019 = vmatmul.mubr.bf16.gmra.mrb[44].mxu1 %v669_v50 }
 0x27b   :  { %v2590_v13 = vpop.f32.mrb[16].mxu1 }
 0x27c   :  { %v2592_v57 = vpop.f32.mrb[17].mxu1 }
 0x27d   :  { %v2594_v14 = vpop.f32.mrb[18].mxu1 }
 0x27e   :  { %v2596_v17 = vpop.f32.mrb[19].mxu1 }
 0x27f   :  { %v895_v16 = vadd.f32 %v2596_v17, %v2592_v57 }
 0x281   :  { %v896_v60 = vadd.f32 %v2590_v13, %v895_v16 }
 0x283   :  { %v2601_v18 = vpop.f32.mrb[20].mxu1  ;;  %v897_v19 = vadd.f32 %v2594_v14, %v896_v60 }
 0x284   :  { %v2604_v28 = vpop.f32.mrb[21].mxu1 }
 0x285   :  { %v898_v29 = vadd.f32 %v897_v19, %v2604_v28  ;;  %v2607_v31 = vpop.f32.mrb[22].mxu1 }
 0x286   :  { %v2609_v6 = vpop.f32.mrb[23].mxu1 }
 0x287   :  { %v899_v35 = vadd.f32 %v898_v29, %v2609_v6 }
 0x289   :  { %v900_v33 = vadd.f32 %v2601_v18, %v899_v35 }
 0x28b   :  { %v2613_v40 = vpop.f32.mrb[24].mxu1  ;;  %v901_v41 = vadd.f32 %v2607_v31, %v900_v33 }
 0x28c   :  { %v2616_v23 = vpop.f32.mrb[25].mxu1 }
 0x28d   :  { %v902_v59 = vadd.f32 %v901_v41, %v2616_v23  ;;  %v2619_v27 = vpop.f32.mrb[26].mxu1 }
 0x28e   :  { %v803_v38 = vpop.f32.mrb[27].mxu1 }
 0x28f   :  { %v903_v21 = vadd.f32 %v902_v59, %v803_v38 }
 0x291   :  { %v904_v1 = vadd.f32 %v2613_v40, %v903_v21 }
 0x293   :  { %v2622_v30 = vpop.f32.mrb[28].mxu1  ;;  %v905_v25 = vadd.f32 %v2619_v27, %v904_v1 }
 0x294   :  { %v816_v43 = vpop.f32.mrb[29].mxu1 }
 0x295   :  { %v906_v2 = vadd.f32 %v905_v25, %v816_v43  ;;  %v2005_v47 = vpop.f32.mrb[30].mxu1 }
 0x296   :  { %v819_v0 = vpop.f32.mrb[31].mxu1 }
 0x297   :  { %v907_v4 = vadd.f32 %v906_v2, %v819_v0 }
 0x299   :  { %v908_v52 = vadd.f32 %v2622_v30, %v907_v4  ;;  %v2098_v4 = vld [vmem:[%s3193_s1 + $0x60] sm:$0xff]  }
 0x29a   :  { %2022 = vmatprep.subr.bf16.mxu0 %v2098_v4 }
 0x29b   :  { %v2008_v53 = vpop.f32.mrb[32].mxu1  ;;  %v909_v5 = vadd.f32 %v2005_v47, %v908_v52  ;;  %2023 = vmatpush3.bf16.msra.mxu0 %v2098_v4 }
 0x29c   :  { %v832_v55 = vpop.f32.mrb[33].mxu1 }
 0x29d   :  { %v910_v3 = vadd.f32 %v909_v5, %v832_v55  ;;  %v2009_v32 = vpop.f32.mrb[34].mxu1 }
 0x29e   :  { %v835_v36 = vpop.f32.mrb[35].mxu1 }
 0x29f   :  { %v911_v62 = vadd.f32 %v910_v3, %v835_v36 }
 0x2a1   :  { %v912_v54 = vadd.f32 %v2008_v53, %v911_v62 }
 0x2a3   :  { %v2012_v34 = vpop.f32.mrb[36].mxu1  ;;  %v913_v7 = vadd.f32 %v2009_v32, %v912_v54 }
 0x2a4   :  { %v848_v44 = vpop.f32.mrb[37].mxu1 }
 0x2a5   :  { %v914_v39 = vadd.f32 %v913_v7, %v848_v44  ;;  %v2013_v45 = vpop.f32.mrb[38].mxu1 }
 0x2a6   :  { %v851_v49 = vpop.f32.mrb[39].mxu1 }
 0x2a7   :  { %v915_v51 = vadd.f32 %v914_v39, %v851_v49 }
 0x2a9   :  { %v916_v42 = vadd.f32 %v2012_v34, %v915_v51 }
 0x2ab   :  { %v2016_v56 = vpop.f32.mrb[40].mxu1  ;;  %v917_v22 = vadd.f32 %v2013_v45, %v916_v42  ;;  %v2101_v42 = vld [vmem:[%s3193_s1 + $0x78] sm:$0xff]  }
 0x2ac   :  { %v864_v58 = vpop.f32.mrb[41].mxu1 }
 0x2ad   :  { %v918_v26 = vadd.f32 %v917_v22, %v864_v58  ;;  %v2017_v61 = vpop.f32.mrb[42].mxu1 }
 0x2ae   :  { %v867_v63 = vpop.f32.mrb[43].mxu1 }
 0x2af   :  { %v919_v8 = vadd.f32 %v918_v26, %v867_v63 }
 0x2b1   :  { %v920_v20 = vadd.f32 %v2016_v56, %v919_v8 }
 0x2b3   :  { %v2020_v24 = vpop.f32.mrb[44].mxu1  ;;  %v921_v37 = vadd.f32 %v2017_v61, %v920_v20 }
 0x2b4   :  { %v880_v9 = vpop.f32.mrb[45].mxu1 }
 0x2b5   :  { %v922_v48 = vadd.f32 %v921_v37, %v880_v9  ;;  %v2021_v46 = vpop.f32.mrb[46].mxu1 }
 0x2b6   :  { %v883_v15 = vpop.f32.mrb[47].mxu1 }
 0x2b7   :  { %v923_v11 = vadd.f32 %v922_v48, %v883_v15 }
 0x2b9   :  { %v924_v50 = vadd.f32 %v2020_v24, %v923_v11 }
 0x2bb   :  { %v925_v16 = vadd.f32 %v2021_v46, %v924_v50 }
 0x2bd   :  { %v926_v60 = vrot.slane %v925_v16, 4 }
 0x2bf   :  { %v927_v19 = vadd.f32 %v926_v60, %v925_v16 }
 0x2c1   :  { %v928_v29 = vrot.slane %v927_v19, 2 }
 0x2c3   :  { %v929_v35 = vadd.f32 %v928_v29, %v927_v19 }
 0x2c5   :  { %v930_v33 = vrot.slane %v929_v35, 1 }
 0x2c7   :  { %v931_v41 = vadd.f32 %v930_v33, %v929_v35 }
 0x2c9   :  { %v932_v59 = vmul.f32 0.00390625, %v931_v41 }
 0x2cb   :  { %v2627_v21 = vsub.f32 %v2592_v57, %v932_v59  ;;  %v2630_v1 = vsub.f32 %v2596_v17, %v932_v59  ;;  %v2633_v25 = vsub.f32 %v2590_v13, %v932_v59  ;;  %v2636_v2 = vsub.f32 %v2594_v14, %v932_v59 }
 0x2cc   :  { %v2642_v52 = vsub.f32 %v2604_v28, %v932_v59  ;;  %v2645_v5 = vsub.f32 %v2609_v6, %v932_v59  ;;  %v2648_v57 = vsub.f32 %v2601_v18, %v932_v59  ;;  %v2651_v17 = vsub.f32 %v2607_v31, %v932_v59 }
 0x2cd   :  { %v2654_v13 = vsub.f32 %v2616_v23, %v932_v59  ;;  %v2656_v14 = vsub.f32 %v803_v38, %v932_v59  ;;  %v2659_v3 = vsub.f32 %v2613_v40, %v932_v59  ;;  %v2662_v28 = vsub.f32 %v2619_v27, %v932_v59  ;;  %v2099_v27 = vld [vmem:[%s3193_s1 + $0x68] sm:$0xff]  }
 0x2ce   :  { %v2664_v6 = vsub.f32 %v816_v43, %v932_v59  ;;  %v2666_v62 = vsub.f32 %v819_v0, %v932_v59  ;;  %v2669_v18 = vsub.f32 %v2622_v30, %v932_v59  ;;  %v2671_v31 = vsub.f32 %v2005_v47, %v932_v59  ;;  %2024 = vmatprep.subr.bf16.mxu0 %v2099_v27 }
 0x2cf   :  { %v2673_v23 = vsub.f32 %v832_v55, %v932_v59  ;;  %v2675_v38 = vsub.f32 %v835_v36, %v932_v59  ;;  %v2677_v40 = vsub.f32 %v2008_v53, %v932_v59  ;;  %v2679_v54 = vsub.f32 %v2009_v32, %v932_v59  ;;  %2025 = vmatpush3.bf16.msra.mxu0 %v2099_v27 }
 0x2d0   :  { %v2684_v43 = vsub.f32 %v848_v44, %v932_v59  ;;  %v2686_v0 = vsub.f32 %v851_v49, %v932_v59  ;;  %v2688_v30 = vsub.f32 %v2012_v34, %v932_v59  ;;  %v2690_v47 = vsub.f32 %v2013_v45, %v932_v59  ;;  %v2100_v34 = vld [vmem:[%s3193_s1 + $0x70] sm:$0xff]  }
 0x2d1   :  { %v2692_v55 = vsub.f32 %v864_v58, %v932_v59  ;;  %v2694_v36 = vsub.f32 %v867_v63, %v932_v59  ;;  %v2696_v53 = vsub.f32 %v2016_v56, %v932_v59  ;;  %v2698_v32 = vsub.f32 %v2017_v61, %v932_v59  ;;  %2026 = vmatprep.subr.bf16.mxu0 %v2100_v34 }
 0x2d2   :  { %v2700_v7 = vsub.f32 %v880_v9, %v932_v59  ;;  %v2702_v39 = vsub.f32 %v883_v15, %v932_v59  ;;  %v2704_v44 = vsub.f32 %v2020_v24, %v932_v59  ;;  %v2706_v49 = vsub.f32 %v2021_v46, %v932_v59 }
 0x2d3   :  { %2027 = vmatpush3.bf16.msra.mxu0 %v2100_v34  ;;  %v965_v45 = vmul.f32 %v2627_v21, %v2627_v21  ;;  %v966_v51 = vmul.f32 %v2630_v1, %v2630_v1  ;;  %v967_v56 = vmul.f32 %v2633_v25, %v2633_v25  ;;  %v968_v58 = vmul.f32 %v2636_v2, %v2636_v2 }
 0x2d4   :  { %2028 = vmatprep.subr.bf16.mxu0 %v2101_v42  ;;  %v969_v61 = vmul.f32 %v2642_v52, %v2642_v52  ;;  %v970_v8 = vmul.f32 %v2645_v5, %v2645_v5  ;;  %v971_v24 = vmul.f32 %v2648_v57, %v2648_v57  ;;  %v972_v9 = vmul.f32 %v2651_v17, %v2651_v17 }
 0x2d5   :  { %v997_v22 = vadd.f32 %v966_v51, %v965_v45  ;;  %v973_v46 = vmul.f32 %v2654_v13, %v2654_v13  ;;  %v974_v11 = vmul.f32 %v2656_v14, %v2656_v14  ;;  %v975_v16 = vmul.f32 %v2659_v3, %v2659_v3 }
 0x2d6   :  { %v976_v19 = vmul.f32 %v2662_v28, %v2662_v28  ;;  %v977_v35 = vmul.f32 %v2664_v6, %v2664_v6  ;;  %v978_v41 = vmul.f32 %v2666_v62, %v2666_v62  ;;  %v979_v4 = vmul.f32 %v2669_v18, %v2669_v18 }
 0x2d7   :  { %2029 = vmatpush3.bf16.msra.mxu0 %v2101_v42  ;;  %v998_v26 = vadd.f32 %v997_v22, %v967_v56  ;;  %v980_v34 = vmul.f32 %v2671_v31, %v2671_v31  ;;  %v981_v51 = vmul.f32 %v2673_v23, %v2673_v23  ;;  %v982_v56 = vmul.f32 %v2675_v38, %v2675_v38 }
 0x2d9   :  { %v999_v63 = vadd.f32 %v998_v26, %v968_v58  ;;  %v983_v58 = vmul.f32 %v2677_v40, %v2677_v40 }
 0x2db   :  { %v1000_v20 = vadd.f32 %v999_v63, %v969_v61  ;;  %v984_v61 = vmul.f32 %v2679_v54, %v2679_v54 }
 0x2dd   :  { %v1001_v37 = vadd.f32 %v1000_v20, %v970_v8  ;;  %v985_v8 = vmul.f32 %v2684_v43, %v2684_v43 }
 0x2df   :  { %v1002_v48 = vadd.f32 %v1001_v37, %v971_v24  ;;  %v986_v24 = vmul.f32 %v2686_v0, %v2686_v0 }
 0x2e1   :  { %v1003_v15 = vadd.f32 %v1002_v48, %v972_v9  ;;  %v987_v9 = vmul.f32 %v2688_v30, %v2688_v30 }
 0x2e3   :  { %v1004_v50 = vadd.f32 %v1003_v15, %v973_v46  ;;  %v988_v46 = vmul.f32 %v2690_v47, %v2690_v47 }
 0x2e5   :  { %v1005_v60 = vadd.f32 %v1004_v50, %v974_v11  ;;  %v989_v11 = vmul.f32 %v2692_v55, %v2692_v55 }
 0x2e7   :  { %v1006_v29 = vadd.f32 %v1005_v60, %v975_v16  ;;  %v990_v16 = vmul.f32 %v2694_v36, %v2694_v36 }
 0x2e9   :  { %v1007_v33 = vadd.f32 %v1006_v29, %v976_v19  ;;  %v991_v19 = vmul.f32 %v2696_v53, %v2696_v53 }
 0x2eb   :  { %v1008_v59 = vadd.f32 %v1007_v33, %v977_v35  ;;  %v992_v35 = vmul.f32 %v2698_v32, %v2698_v32 }
 0x2ed   :  { %v1009_v27 = vadd.f32 %v1008_v59, %v978_v41  ;;  %v993_v41 = vmul.f32 %v2700_v7, %v2700_v7 }
 0x2ef   :  { %v1010_v45 = vadd.f32 %v1009_v27, %v979_v4  ;;  %v994_v4 = vmul.f32 %v2702_v39, %v2702_v39 }
 0x2f1   :  { %v1011_v42 = vadd.f32 %v1010_v45, %v980_v34  ;;  %v995_v34 = vmul.f32 %v2704_v44, %v2704_v44 }
 0x2f3   :  { %v1012_v22 = vadd.f32 %v1011_v42, %v981_v51  ;;  %v996_v51 = vmul.f32 %v2706_v49, %v2706_v49 }
 0x2f5   :  { %v1013_v26 = vadd.f32 %v1012_v22, %v982_v56 }
 0x2f7   :  { %v1014_v63 = vadd.f32 %v1013_v26, %v983_v58 }
 0x2f9   :  { %v1015_v20 = vadd.f32 %v1014_v63, %v984_v61 }
 0x2fb   :  { %v1016_v37 = vadd.f32 %v1015_v20, %v985_v8 }
 0x2fd   :  { %v1017_v48 = vadd.f32 %v1016_v37, %v986_v24 }
 0x2ff   :  { %v1018_v15 = vadd.f32 %v1017_v48, %v987_v9  ;;  %v1040_v48 = vsub.s32 2, %v2479_v10 }
 0x301   :  { %v1019_v50 = vadd.f32 %v1018_v15, %v988_v46  ;;  %v1076_v46 = vsub.s32 3, %v2479_v10 }
 0x303   :  { %v1020_v60 = vadd.f32 %v1019_v50, %v989_v11  ;;  %v2784_v11 = vrot.slane %v2484_v12, %v1076_v46 }
 0x305   :  { %v1021_v29 = vadd.f32 %v1020_v60, %v990_v16 }
 0x307   :  { %v1022_v33 = vadd.f32 %v1021_v29, %v991_v19 }
 0x309   :  { %v1023_v59 = vadd.f32 %v1022_v33, %v992_v35 }
 0x30b   :  { %v1024_v27 = vadd.f32 %v1023_v59, %v993_v41 }
 0x30d   :  { %v1025_v45 = vadd.f32 %v1024_v27, %v994_v4 }
 0x30f   :  { %v1026_v42 = vadd.f32 %v1025_v45, %v995_v34 }
 0x311   :  { %v1027_v56 = vadd.f32 %v1026_v42, %v996_v51 }
 0x313   :  { %v1028_v22 = vrot.slane %v1027_v56, 4 }
 0x315   :  { %v1029_v58 = vadd.f32 %v1028_v22, %v1027_v56 }
 0x317   :  { %v1030_v26 = vrot.slane %v1029_v58, 2 }
 0x319   :  { %v1031_v61 = vadd.f32 %v1030_v26, %v1029_v58 }
 0x31b   :  { %v1032_v63 = vrot.slane %v1031_v61, 1 }
 0x31d   :  { %v1033_v8 = vadd.f32 %v1032_v63, %v1031_v61 }
 0x31f   :  { %v1034_v20 = vmul.f32 0.00390625, %v1033_v8 }
 0x321   :  { %v1035_v24 = vadd.f32 1e-05, %v1034_v20 }
 0x323   :  { %2105 = vrsqrt.f32 %v1035_v24 }
 0x32d   :  { %v2106_v37 = vpop.eup %2105 }
 0x32e   :  { %v1037_v9 = vmul.f32 %v2106_v37, %v2484_v12 }
 0x330   :  { %v2781_v15 = vrot.slane %v1037_v9, %v1040_v48 }
 0x332   :  { %v1042_v50 = vmul.f32 %v2781_v15, %v2627_v21  ;;  %v1043_v16 = vmul.f32 %v2781_v15, %v2630_v1  ;;  %v1044_v60 = vmul.f32 %v2781_v15, %v2633_v25  ;;  %v1045_v19 = vmul.f32 %v2781_v15, %v2636_v2 }
 0x333   :  { %v1046_v29 = vmul.f32 %v2781_v15, %v2642_v52  ;;  %v1047_v35 = vmul.f32 %v2781_v15, %v2645_v5  ;;  %v1048_v52 = vmul.f32 %v2781_v15, %v2648_v57  ;;  %v1049_v5 = vmul.f32 %v2781_v15, %v2651_v17 }
 0x334   :  { %v1078_v12 = vadd.f32 %v2784_v11, %v1042_v50  ;;  %v1079_v33 = vadd.f32 %v2784_v11, %v1043_v16  ;;  %v1080_v21 = vadd.f32 %v2784_v11, %v1044_v60  ;;  %v1081_v1 = vadd.f32 %v2784_v11, %v1045_v19 }
 0x335   :  { %v1082_v41 = vadd.f32 %v2784_v11, %v1046_v29  ;;  %v1083_v25 = vadd.f32 %v2784_v11, %v1047_v35  ;;  %v1050_v34 = vmul.f32 %v2781_v15, %v2654_v13  ;;  %v1051_v45 = vmul.f32 %v2781_v15, %v2656_v14 }
 0x336   :  { %v1110_v59 = vmul.f32 0.2, %v1078_v12  ;;  %v1111_v2 = vmul.f32 0.2, %v1079_v33  ;;  %v1112_v4 = vmul.f32 0.2, %v1080_v21  ;;  %v1084_v61 = vadd.f32 %v2784_v11, %v1048_v52 }
 0x337   :  { %v1113_v27 = vmul.f32 0.2, %v1081_v1  ;;  %v1114_v51 = vmul.f32 0.2, %v1082_v41  ;;  %v1115_v42 = vmul.f32 0.2, %v1083_v25  ;;  %v1085_v63 = vadd.f32 %v2784_v11, %v1049_v5 }
 0x338   :  { %v1142_v56 = vmax.f32 %v1078_v12, %v1110_v59  ;;  %v1143_v22 = vmax.f32 %v1079_v33, %v1111_v2  ;;  %v1144_v58 = vmax.f32 %v1080_v21, %v1112_v4  ;;  %v1086_v57 = vadd.f32 %v2784_v11, %v1050_v34 }
 0x339   :  { %v1145_v26 = vmax.f32 %v1081_v1, %v1113_v27  ;;  %v1087_v17 = vadd.f32 %v2784_v11, %v1051_v45  ;;  %v1146_v8 = vmax.f32 %v1082_v41, %v1114_v51  ;;  %v1147_v20 = vmax.f32 %v1083_v25, %v1115_v42 }
 0x33a   :  { %v1052_v13 = vmul.f32 %v2781_v15, %v2659_v3  ;;  %v1174_v24 = vpack.c.bf16 %v1143_v22, %v1142_v56  ;;  %v1053_v37 = vmul.f32 %v2781_v15, %v2662_v28  ;;  %v1054_v9 = vmul.f32 %v2781_v15, %v2664_v6 }
 0x33b   :  { %v1175_v14 = vpack.c.bf16 %v1145_v26, %v1144_v58  ;;  %v1116_v48 = vmul.f32 0.2, %v1084_v61  ;;  %v1117_v46 = vmul.f32 0.2, %v1085_v63  ;;  %v1055_v50 = vmul.f32 %v2781_v15, %v2666_v62 }
 0x33c   :  { %v1118_v16 = vmul.f32 0.2, %v1086_v57  ;;  %v1119_v60 = vmul.f32 0.2, %v1087_v17  ;;  %2030 = vmatprep.mubr.msk.bf16.mxu0 %vm164_vm0, %v1174_v24  ;;  %v1176_v19 = vpack.c.bf16 %v1147_v20, %v1146_v8  ;;  %v1088_v3 = vadd.f32 %v2784_v11, %v1052_v13 }
 0x33d   :  { %2031 = vmatmul.mubr.msk.bf16.vlgmr.msra.gmra.mrb[16].mxu0 %vm164_vm0, %v1175_v14  ;;  %v1089_v28 = vadd.f32 %v2784_v11, %v1053_v37  ;;  %v1148_v29 = vmax.f32 %v1084_v61, %v1116_v48  ;;  %v1149_v6 = vmax.f32 %v1085_v63, %v1117_v46  ;;  %v1090_v35 = vadd.f32 %v2784_v11, %v1054_v9 }
 0x33e   :  { %2034 = vmatprep.mubr.msk.bf16.mxu0 %vm164_vm0, %v1176_v19  ;;  %v1091_v12 = vadd.f32 %v2784_v11, %v1055_v50  ;;  %v1150_v62 = vmax.f32 %v1086_v57, %v1118_v16  ;;  %v1151_v33 = vmax.f32 %v1087_v17, %v1119_v60  ;;  %v1056_v21 = vmul.f32 %v2781_v15, %v2669_v18 }
 0x33f   :  { %v1057_v1 = vmul.f32 %v2781_v15, %v2671_v31  ;;  %v1058_v41 = vmul.f32 %v2781_v15, %v2673_v23  ;;  %v1120_v25 = vmul.f32 0.2, %v1088_v3  ;;  %v1121_v59 = vmul.f32 0.2, %v1089_v28 }
 0x340   :  { %v1177_v2 = vpack.c.bf16 %v1149_v6, %v1148_v29  ;;  %v1059_v4 = vmul.f32 %v2781_v15, %v2675_v38  ;;  %v1122_v27 = vmul.f32 0.2, %v1090_v35  ;;  %v1123_v52 = vmul.f32 0.2, %v1091_v12 }
 0x341   :  { %v1178_v5 = vpack.c.bf16 %v1151_v33, %v1150_v62  ;;  %v1092_v18 = vadd.f32 %v2784_v11, %v1056_v21  ;;  %v1093_v31 = vadd.f32 %v2784_v11, %v1057_v1  ;;  %v1152_v34 = vmax.f32 %v1088_v3, %v1120_v25 }
 0x342   :  { %v1153_v45 = vmax.f32 %v1089_v28, %v1121_v59  ;;  %v1094_v23 = vadd.f32 %v2784_v11, %v1058_v41  ;;  %v1095_v51 = vadd.f32 %v2784_v11, %v1059_v4  ;;  %v1154_v42 = vmax.f32 %v1090_v35, %v1122_v27 }
 0x343   :  { %v1155_v56 = vmax.f32 %v1091_v12, %v1123_v52  ;;  %v1060_v38 = vmul.f32 %v2781_v15, %v2677_v40  ;;  %v1061_v22 = vmul.f32 %v2781_v15, %v2679_v54  ;;  %v1062_v58 = vmul.f32 %v2781_v15, %v2684_v43 }
 0x344   :  { %v1124_v26 = vmul.f32 0.2, %v1092_v18  ;;  %v1125_v61 = vmul.f32 0.2, %v1093_v31  ;;  %v1179_v63 = vpack.c.bf16 %v1153_v45, %v1152_v34  ;;  %v1063_v57 = vmul.f32 %v2781_v15, %v2686_v0 }
 0x345   :  { %2035 = vmatmul.mubr.msk.bf16.gmra.mrb[20].mxu0 %vm164_vm0, %v1177_v2  ;;  %v1126_v17 = vmul.f32 0.2, %v1094_v23  ;;  %v1127_v8 = vmul.f32 0.2, %v1095_v51  ;;  %v1180_v20 = vpack.c.bf16 %v1155_v56, %v1154_v42  ;;  %v1096_v40 = vadd.f32 %v2784_v11, %v1060_v38 }
 0x346   :  { %2038 = vmatprep.mubr.msk.bf16.mxu0 %vm164_vm0, %v1178_v5  ;;  %v1097_v54 = vadd.f32 %v2784_v11, %v1061_v22  ;;  %v1156_v13 = vmax.f32 %v1092_v18, %v1124_v26  ;;  %v1157_v14 = vmax.f32 %v1093_v31, %v1125_v61  ;;  %v1098_v43 = vadd.f32 %v2784_v11, %v1062_v58 }
 0x347   :  { %v1099_v24 = vadd.f32 %v2784_v11, %v1063_v57  ;;  %v1158_v37 = vmax.f32 %v1094_v23, %v1126_v17  ;;  %v1159_v9 = vmax.f32 %v1095_v51, %v1127_v8  ;;  %v1064_v0 = vmul.f32 %v2781_v15, %v2688_v30 }
 0x348   :  { %v1065_v48 = vmul.f32 %v2781_v15, %v2690_v47  ;;  %v1066_v46 = vmul.f32 %v2781_v15, %v2692_v55  ;;  %v1128_v50 = vmul.f32 0.2, %v1096_v40  ;;  %v1129_v16 = vmul.f32 0.2, %v1097_v54 }
 0x349   :  { %v1181_v60 = vpack.c.bf16 %v1157_v14, %v1156_v13  ;;  %v1067_v19 = vmul.f32 %v2781_v15, %v2694_v36  ;;  %v1130_v3 = vmul.f32 0.2, %v1098_v43  ;;  %v1131_v28 = vmul.f32 0.2, %v1099_v24 }
 0x34a   :  { %v1182_v29 = vpack.c.bf16 %v1159_v9, %v1158_v37  ;;  %v1100_v30 = vadd.f32 %v2784_v11, %v1064_v0  ;;  %v1101_v47 = vadd.f32 %v2784_v11, %v1065_v48  ;;  %v1160_v6 = vmax.f32 %v1096_v40, %v1128_v50 }
 0x34b   :  { %v1161_v35 = vmax.f32 %v1097_v54, %v1129_v16  ;;  %v1102_v55 = vadd.f32 %v2784_v11, %v1066_v46  ;;  %v1103_v12 = vadd.f32 %v2784_v11, %v1067_v19  ;;  %v1162_v62 = vmax.f32 %v1098_v43, %v1130_v3 }
 0x34c   :  { %v1163_v33 = vmax.f32 %v1099_v24, %v1131_v28  ;;  %v1071_v36 = vmul.f32 %v2781_v15, %v2702_v39  ;;  %v1068_v21 = vmul.f32 %v2781_v15, %v2696_v53  ;;  %v1069_v1 = vmul.f32 %v2781_v15, %v2698_v32 }
 0x34d   :  { %2039 = vmatmul.mubr.msk.bf16.gmra.mrb[24].mxu0 %vm164_vm0, %v1179_v63  ;;  %v1132_v41 = vmul.f32 0.2, %v1100_v30  ;;  %v1133_v25 = vmul.f32 0.2, %v1101_v47  ;;  %v1183_v59 = vpack.c.bf16 %v1161_v35, %v1160_v6  ;;  %v1070_v2 = vmul.f32 %v2781_v15, %v2700_v7 }
 0x34e   :  { %2042 = vmatprep.mubr.msk.bf16.mxu0 %vm164_vm0, %v1180_v20  ;;  %v1134_v4 = vmul.f32 0.2, %v1102_v55  ;;  %v1135_v27 = vmul.f32 0.2, %v1103_v12  ;;  %v1184_v52 = vpack.c.bf16 %v1163_v33, %v1162_v62  ;;  %v1104_v39 = vadd.f32 %v2784_v11, %v1068_v21 }
 0x34f   :  { %v1105_v53 = vadd.f32 %v2784_v11, %v1069_v1  ;;  %v1164_v5 = vmax.f32 %v1100_v30, %v1132_v41  ;;  %v1165_v18 = vmax.f32 %v1101_v47, %v1133_v25  ;;  %v1107_v32 = vadd.f32 %v2784_v11, %v1071_v36 }
 0x350   :  { %v1106_v31 = vadd.f32 %v2784_v11, %v1070_v2  ;;  %v1166_v34 = vmax.f32 %v1102_v55, %v1134_v4  ;;  %v1167_v45 = vmax.f32 %v1103_v12, %v1135_v27  ;;  %v1072_v7 = vmul.f32 %v2781_v15, %v2704_v44 }
 0x351   :  { %v1073_v23 = vmul.f32 %v2781_v15, %v2706_v49  ;;  %v1136_v51 = vmul.f32 0.2, %v1104_v39  ;;  %v1137_v42 = vmul.f32 0.2, %v1105_v53  ;;  %v1185_v56 = vpack.c.bf16 %v1165_v18, %v1164_v5 }
 0x352   :  { %v1139_v38 = vmul.f32 0.2, %v1107_v32  ;;  %v1138_v22 = vmul.f32 0.2, %v1106_v31  ;;  %v1186_v58 = vpack.c.bf16 %v1167_v45, %v1166_v34  ;;  %v1108_v26 = vadd.f32 %v2784_v11, %v1072_v7 }
 0x353   :  { %v1109_v61 = vadd.f32 %v2784_v11, %v1073_v23  ;;  %v1168_v63 = vmax.f32 %v1104_v39, %v1136_v51  ;;  %v1169_v57 = vmax.f32 %v1105_v53, %v1137_v42 }
 0x354   :  { %v1171_v44 = vmax.f32 %v1107_v32, %v1139_v38  ;;  %v1170_v17 = vmax.f32 %v1106_v31, %v1138_v22  ;;  %v1140_v8 = vmul.f32 0.2, %v1108_v26 }
 0x355   :  { %2043 = vmatmul.mubr.msk.bf16.gmra.mrb[28].mxu0 %vm164_vm0, %v1181_v60  ;;  %v1141_v49 = vmul.f32 0.2, %v1109_v61  ;;  %v1187_v15 = vpack.c.bf16 %v1169_v57, %v1168_v63 }
 0x356   :  { %2046 = vmatprep.mubr.msk.bf16.mxu0 %vm164_vm0, %v1182_v29  ;;  %v1188_v20 = vpack.c.bf16 %v1171_v44, %v1170_v17  ;;  %v1172_v40 = vmax.f32 %v1108_v26, %v1140_v8 }
 0x357   :  { %v1173_v54 = vmax.f32 %v1109_v61, %v1141_v49 }
 0x359   :  { %v1189_v13 = vpack.c.bf16 %v1173_v54, %v1172_v40 }
 0x35d   :  { %2047 = vmatmul.mubr.msk.bf16.gmra.mrb[32].mxu0 %vm164_vm0, %v1183_v59 }
 0x35e   :  { %2050 = vmatprep.mubr.msk.bf16.mxu0 %vm164_vm0, %v1184_v52 }
 0x365   :  { %2051 = vmatmul.mubr.msk.bf16.gmra.mrb[36].mxu0 %vm164_vm0, %v1185_v56 }
 0x366   :  { %2054 = vmatprep.mubr.msk.bf16.mxu0 %vm164_vm0, %v1186_v58 }
 0x36d   :  { %2055 = vmatmul.mubr.msk.bf16.gmra.mrb[40].mxu0 %vm164_vm0, %v1187_v15 }
 0x36e   :  { %2058 = vmatprep.mubr.msk.bf16.mxu0 %vm164_vm0, %v1188_v20 }
 0x375   :  { %2059 = vmatmul.mubr.msk.bf16.gmra.mrb[44].mxu0 %vm164_vm0, %v1189_v13 }
 0x410   :  { %v2898_v14 = vpop.f32.mrb[16].mxu0 }
 0x411   :  { %v2900_v11 = vpop.f32.mrb[17].mxu0 }
 0x412   :  { %v2902_v43 = vpop.f32.mrb[18].mxu0 }
 0x413   :  { %v2904_v24 = vpop.f32.mrb[19].mxu0 }
 0x414   :  { %v1431_v37 = vadd.f32 %v2904_v24, %v2900_v11 }
 0x416   :  { %v1432_v9 = vadd.f32 %v2898_v14, %v1431_v37 }
 0x418   :  { %v2909_v0 = vpop.f32.mrb[20].mxu0  ;;  %v1433_v48 = vadd.f32 %v2902_v43, %v1432_v9 }
 0x419   :  { %v2912_v46 = vpop.f32.mrb[21].mxu0 }
 0x41a   :  { %v1434_v50 = vadd.f32 %v1433_v48, %v2912_v46  ;;  %v2915_v16 = vpop.f32.mrb[22].mxu0 }
 0x41b   :  { %v2917_v60 = vpop.f32.mrb[23].mxu0 }
 0x41c   :  { %v1435_v19 = vadd.f32 %v1434_v50, %v2917_v60 }
 0x41e   :  { %v1436_v3 = vadd.f32 %v2909_v0, %v1435_v19 }
 0x420   :  { %v2921_v28 = vpop.f32.mrb[24].mxu0  ;;  %v1437_v29 = vadd.f32 %v2915_v16, %v1436_v3 }
 0x421   :  { %v1336_v30 = vpop.f32.mrb[25].mxu0 }
 0x422   :  { %v1438_v47 = vadd.f32 %v1437_v29, %v1336_v30  ;;  %v2924_v6 = vpop.f32.mrb[26].mxu0 }
 0x423   :  { %v1339_v35 = vpop.f32.mrb[27].mxu0 }
 0x424   :  { %v1439_v55 = vadd.f32 %v1438_v47, %v1339_v35 }
 0x426   :  { %v1440_v12 = vadd.f32 %v2921_v28, %v1439_v55 }
 0x428   :  { %v2044_v62 = vpop.f32.mrb[28].mxu0  ;;  %v1441_v33 = vadd.f32 %v2924_v6, %v1440_v12 }
 0x429   :  { %v1352_v36 = vpop.f32.mrb[29].mxu0 }
 0x42a   :  { %v1442_v21 = vadd.f32 %v1441_v33, %v1352_v36  ;;  %v2045_v1 = vpop.f32.mrb[30].mxu0 }
 0x42b   :  { %v1355_v41 = vpop.f32.mrb[31].mxu0 }
 0x42c   :  { %v1443_v25 = vadd.f32 %v1442_v21, %v1355_v41 }
 0x42e   :  { %v1444_v59 = vadd.f32 %v2044_v62, %v1443_v25 }
 0x430   :  { %v2048_v2 = vpop.f32.mrb[32].mxu0  ;;  %v1445_v4 = vadd.f32 %v2045_v1, %v1444_v59 }
 0x431   :  { %v1368_v27 = vpop.f32.mrb[33].mxu0 }
 0x432   :  { %v1446_v52 = vadd.f32 %v1445_v4, %v1368_v27  ;;  %v2049_v39 = vpop.f32.mrb[34].mxu0 }
 0x433   :  { %v1371_v53 = vpop.f32.mrb[35].mxu0 }
 0x434   :  { %v1447_v5 = vadd.f32 %v1446_v52, %v1371_v53 }
 0x436   :  { %v1448_v18 = vadd.f32 %v2048_v2, %v1447_v5 }
 0x438   :  { %v2052_v32 = vpop.f32.mrb[36].mxu0  ;;  %v1449_v31 = vadd.f32 %v2049_v39, %v1448_v18 }
 0x439   :  { %v1384_v34 = vpop.f32.mrb[37].mxu0 }
 0x43a   :  { %v1450_v45 = vadd.f32 %v1449_v31, %v1384_v34  ;;  %v2053_v7 = vpop.f32.mrb[38].mxu0 }
 0x43b   :  { %v1387_v23 = vpop.f32.mrb[39].mxu0 }
 0x43c   :  { %v1451_v51 = vadd.f32 %v1450_v45, %v1387_v23 }
 0x43e   :  { %v1452_v42 = vadd.f32 %v2052_v32, %v1451_v51 }
 0x440   :  { %v2056_v56 = vpop.f32.mrb[40].mxu0  ;;  %v1453_v38 = vadd.f32 %v2053_v7, %v1452_v42 }
 0x441   :  { %v1400_v22 = vpop.f32.mrb[41].mxu0 }
 0x442   :  { %v1454_v58 = vadd.f32 %v1453_v38, %v1400_v22  ;;  %v2057_v26 = vpop.f32.mrb[42].mxu0 }
 0x443   :  { %v1403_v61 = vpop.f32.mrb[43].mxu0 }
 0x444   :  { %v1455_v63 = vadd.f32 %v1454_v58, %v1403_v61 }
 0x446   :  { %v1456_v57 = vadd.f32 %v2056_v56, %v1455_v63 }
 0x448   :  { %v2060_v44 = vpop.f32.mrb[44].mxu0  ;;  %v1457_v17 = vadd.f32 %v2057_v26, %v1456_v57 }
 0x449   :  { %v1416_v8 = vpop.f32.mrb[45].mxu0 }
 0x44a   :  { %v1458_v49 = vadd.f32 %v1457_v17, %v1416_v8  ;;  %v2061_v15 = vpop.f32.mrb[46].mxu0 }
 0x44b   :  { %v1419_v20 = vpop.f32.mrb[47].mxu0 }
 0x44c   :  { %v1459_v40 = vadd.f32 %v1458_v49, %v1419_v20 }
 0x44e   :  { %v1460_v54 = vadd.f32 %v2060_v44, %v1459_v40 }
 0x450   :  { %v1461_v13 = vadd.f32 %v2061_v15, %v1460_v54 }
 0x452   :  { %v1462_v37 = vrot.slane %v1461_v13, 4 }
 0x454   :  { %v1463_v9 = vadd.f32 %v1462_v37, %v1461_v13 }
 0x456   :  { %v1464_v48 = vrot.slane %v1463_v9, 2 }
 0x458   :  { %v1465_v50 = vadd.f32 %v1464_v48, %v1463_v9 }
 0x45a   :  { %v1466_v19 = vrot.slane %v1465_v50, 1 }
 0x45c   :  { %v1467_v3 = vadd.f32 %v1466_v19, %v1465_v50 }
 0x45e   :  { %v1468_v29 = vmul.f32 0.00390625, %v1467_v3 }
 0x460   :  { %v2929_v47 = vsub.f32 %v2900_v11, %v1468_v29  ;;  %v2932_v55 = vsub.f32 %v2904_v24, %v1468_v29  ;;  %v2935_v12 = vsub.f32 %v2898_v14, %v1468_v29  ;;  %v2938_v33 = vsub.f32 %v2902_v43, %v1468_v29 }
 0x461   :  { %v2941_v21 = vsub.f32 %v2912_v46, %v1468_v29  ;;  %v2944_v25 = vsub.f32 %v2917_v60, %v1468_v29  ;;  %v2947_v59 = vsub.f32 %v2909_v0, %v1468_v29  ;;  %v2950_v11 = vsub.f32 %v2915_v16, %v1468_v29 }
 0x462   :  { %v2952_v24 = vsub.f32 %v1336_v30, %v1468_v29  ;;  %v2954_v4 = vsub.f32 %v1339_v35, %v1468_v29  ;;  %v2957_v14 = vsub.f32 %v2921_v28, %v1468_v29  ;;  %v2960_v43 = vsub.f32 %v2924_v6, %v1468_v29 }
 0x463   :  { %v2962_v46 = vsub.f32 %v1352_v36, %v1468_v29  ;;  %v2964_v60 = vsub.f32 %v1355_v41, %v1468_v29  ;;  %v2966_v52 = vsub.f32 %v2044_v62, %v1468_v29  ;;  %v2968_v0 = vsub.f32 %v2045_v1, %v1468_v29 }
 0x464   :  { %v2970_v16 = vsub.f32 %v1368_v27, %v1468_v29  ;;  %v2972_v30 = vsub.f32 %v1371_v53, %v1468_v29  ;;  %v2974_v35 = vsub.f32 %v2048_v2, %v1468_v29  ;;  %v2976_v5 = vsub.f32 %v2049_v39, %v1468_v29 }
 0x465   :  { %v2978_v28 = vsub.f32 %v1384_v34, %v1468_v29  ;;  %v2980_v6 = vsub.f32 %v1387_v23, %v1468_v29  ;;  %v2982_v36 = vsub.f32 %v2052_v32, %v1468_v29  ;;  %v2984_v41 = vsub.f32 %v2053_v7, %v1468_v29 }
 0x466   :  { %v2986_v62 = vsub.f32 %v1400_v22, %v1468_v29  ;;  %v2988_v1 = vsub.f32 %v1403_v61, %v1468_v29  ;;  %v2990_v27 = vsub.f32 %v2056_v56, %v1468_v29  ;;  %v2992_v53 = vsub.f32 %v2057_v26, %v1468_v29 }
 0x467   :  { %v2994_v2 = vsub.f32 %v1416_v8, %v1468_v29  ;;  %v2996_v39 = vsub.f32 %v1419_v20, %v1468_v29  ;;  %v2998_v18 = vsub.f32 %v2060_v44, %v1468_v29  ;;  %v3000_v31 = vsub.f32 %v2061_v15, %v1468_v29 }
 0x468   :  { %v1501_v32 = vmul.f32 %v2929_v47, %v2929_v47  ;;  %v1502_v34 = vmul.f32 %v2932_v55, %v2932_v55  ;;  %v1503_v45 = vmul.f32 %v2935_v12, %v2935_v12  ;;  %v1504_v23 = vmul.f32 %v2938_v33, %v2938_v33 }
 0x469   :  { %v1505_v42 = vmul.f32 %v2941_v21, %v2941_v21  ;;  %v1506_v38 = vmul.f32 %v2944_v25, %v2944_v25  ;;  %v1507_v58 = vmul.f32 %v2947_v59, %v2947_v59  ;;  %v1508_v61 = vmul.f32 %v2950_v11, %v2950_v11 }
 0x46a   :  { %v1533_v7 = vadd.f32 %v1502_v34, %v1501_v32  ;;  %v1509_v57 = vmul.f32 %v2952_v24, %v2952_v24  ;;  %v1510_v17 = vmul.f32 %v2954_v4, %v2954_v4  ;;  %v1511_v49 = vmul.f32 %v2957_v14, %v2957_v14 }
 0x46b   :  { %v1512_v20 = vmul.f32 %v2960_v43, %v2960_v43  ;;  %v1513_v54 = vmul.f32 %v2962_v46, %v2962_v46  ;;  %v1514_v37 = vmul.f32 %v2964_v60, %v2964_v60  ;;  %v1515_v48 = vmul.f32 %v2966_v52, %v2966_v52 }
 0x46c   :  { %v1534_v51 = vadd.f32 %v1533_v7, %v1503_v45  ;;  %v1516_v19 = vmul.f32 %v2968_v0, %v2968_v0  ;;  %v1517_v29 = vmul.f32 %v2970_v16, %v2970_v16  ;;  %v1518_v34 = vmul.f32 %v2972_v30, %v2972_v30 }
 0x46d   :  { %v1519_v7 = vmul.f32 %v2974_v35, %v2974_v35 }
 0x46e   :  { %v1535_v56 = vadd.f32 %v1534_v51, %v1504_v23  ;;  %v1520_v51 = vmul.f32 %v2976_v5, %v2976_v5 }
 0x470   :  { %v1536_v22 = vadd.f32 %v1535_v56, %v1505_v42  ;;  %v1521_v56 = vmul.f32 %v2978_v28, %v2978_v28 }
 0x472   :  { %v1537_v26 = vadd.f32 %v1536_v22, %v1506_v38  ;;  %v1522_v22 = vmul.f32 %v2980_v6, %v2980_v6 }
 0x474   :  { %v1538_v63 = vadd.f32 %v1537_v26, %v1507_v58  ;;  %v1523_v26 = vmul.f32 %v2982_v36, %v2982_v36 }
 0x476   :  { %v1539_v44 = vadd.f32 %v1538_v63, %v1508_v61  ;;  %v1524_v63 = vmul.f32 %v2984_v41, %v2984_v41 }
 0x478   :  { %v1540_v8 = vadd.f32 %v1539_v44, %v1509_v57  ;;  %v1525_v44 = vmul.f32 %v2986_v62, %v2986_v62 }
 0x47a   :  { %v1541_v15 = vadd.f32 %v1540_v8, %v1510_v17  ;;  %v1526_v8 = vmul.f32 %v2988_v1, %v2988_v1 }
 0x47c   :  { %v1542_v40 = vadd.f32 %v1541_v15, %v1511_v49  ;;  %v1527_v15 = vmul.f32 %v2990_v27, %v2990_v27 }
 0x47e   :  { %v1543_v13 = vadd.f32 %v1542_v40, %v1512_v20  ;;  %v1528_v40 = vmul.f32 %v2992_v53, %v2992_v53 }
 0x480   :  { %v1544_v9 = vadd.f32 %v1543_v13, %v1513_v54  ;;  %v1529_v13 = vmul.f32 %v2994_v2, %v2994_v2 }
 0x482   :  { %v1545_v50 = vadd.f32 %v1544_v9, %v1514_v37  ;;  %v1530_v9 = vmul.f32 %v2996_v39, %v2996_v39 }
 0x484   :  { %v1546_v3 = vadd.f32 %v1545_v50, %v1515_v48  ;;  %v3065_v50 = vld [vmem:[%s3193_s1 + $0x80] sm:$0xff]  }
 0x485   :  { %1932 = vmatprep.mubr.bf16.mxu1 %v3065_v50 }
 0x486   :  { %v1547_v32 = vadd.f32 %v1546_v3, %v1516_v19  ;;  %v1531_v19 = vmul.f32 %v2998_v18, %v2998_v18 }
 0x488   :  { %v1548_v45 = vadd.f32 %v1547_v32, %v1517_v29  ;;  %v1532_v29 = vmul.f32 %v3000_v31, %v3000_v31 }
 0x48a   :  { %v1549_v23 = vadd.f32 %v1548_v45, %v1518_v34 }
 0x48c   :  { %v1550_v42 = vadd.f32 %v1549_v23, %v1519_v7 }
 0x48e   :  { %v1551_v38 = vadd.f32 %v1550_v42, %v1520_v51 }
 0x490   :  { %v1552_v58 = vadd.f32 %v1551_v38, %v1521_v56 }
 0x492   :  { %v1553_v61 = vadd.f32 %v1552_v58, %v1522_v22 }
 0x494   :  { %v1554_v57 = vadd.f32 %v1553_v61, %v1523_v26  ;;  %v2109_v26 = vld [vmem:[%s3195_s2] sm:$0xff] }
 0x496   :  { %v1555_v17 = vadd.f32 %v1554_v57, %v1524_v63  ;;  %v1576_v63 = vsub.s32 4, %v2479_v10 }
 0x498   :  { %v1556_v49 = vadd.f32 %v1555_v17, %v1525_v44 }
 0x49a   :  { %v1557_v20 = vadd.f32 %v1556_v49, %v1526_v8  ;;  %v1612_v49 = vsub.s32 5, %v2479_v10 }
 0x49c   :  { %v1558_v54 = vadd.f32 %v1557_v20, %v1527_v15  ;;  %v3085_v15 = vrot.slane %v2109_v26, %v1612_v49 }
 0x49e   :  { %v1559_v37 = vadd.f32 %v1558_v54, %v1528_v40 }
 0x4a0   :  { %v1560_v48 = vadd.f32 %v1559_v37, %v1529_v13 }
 0x4a2   :  { %v1561_v3 = vadd.f32 %v1560_v48, %v1530_v9 }
 0x4a4   :  { %v1562_v32 = vadd.f32 %v1561_v3, %v1531_v19 }
 0x4a6   :  { %v1563_v34 = vadd.f32 %v1562_v32, %v1532_v29 }
 0x4a8   :  { %v1564_v45 = vrot.slane %v1563_v34, 4 }
 0x4aa   :  { %v1565_v7 = vadd.f32 %v1564_v45, %v1563_v34 }
 0x4ac   :  { %v1566_v23 = vrot.slane %v1565_v7, 2 }
 0x4ae   :  { %v1567_v51 = vadd.f32 %v1566_v23, %v1565_v7 }
 0x4b0   :  { %v1568_v42 = vrot.slane %v1567_v51, 1 }
 0x4b2   :  { %v1569_v56 = vadd.f32 %v1568_v42, %v1567_v51 }
 0x4b4   :  { %v1570_v38 = vmul.f32 0.00390625, %v1569_v56 }
 0x4b6   :  { %v1571_v22 = vadd.f32 1e-05, %v1570_v38 }
 0x4b8   :  { %2107 = vrsqrt.f32 %v1571_v22 }
 0x4c2   :  { %v2108_v58 = vpop.eup %2107 }
 0x4c3   :  { %v1573_v61 = vmul.f32 %v2109_v26, %v2108_v58 }
 0x4c5   :  { %v3076_v57 = vrot.slane %v1573_v61, %v1576_v63 }
 0x4c7   :  { %v1595_v44 = vmul.f32 %v3076_v57, %v2972_v30  ;;  %v1596_v17 = vmul.f32 %v3076_v57, %v2974_v35  ;;  %v1597_v8 = vmul.f32 %v3076_v57, %v2976_v5  ;;  %v1578_v20 = vmul.f32 %v3076_v57, %v2929_v47 }
 0x4c8   :  { %v1579_v40 = vmul.f32 %v3076_v57, %v2932_v55  ;;  %v1594_v54 = vmul.f32 %v3076_v57, %v2970_v16  ;;  %v1580_v55 = vmul.f32 %v3076_v57, %v2935_v12  ;;  %v1581_v16 = vmul.f32 %v3076_v57, %v2938_v33 }
 0x4c9   :  { %v1614_v30 = vadd.f32 %v3085_v15, %v1578_v20  ;;  %v1631_v5 = vadd.f32 %v3085_v15, %v1595_v44  ;;  %v1632_v10 = vadd.f32 %v3085_v15, %v1596_v17  ;;  %v1633_v37 = vadd.f32 %v3085_v15, %v1597_v8 }
 0x4ca   :  { %v1615_v35 = vadd.f32 %v3085_v15, %v1579_v40  ;;  %v1630_v13 = vadd.f32 %v3085_v15, %v1594_v54  ;;  %v1598_v48 = vmul.f32 %v3076_v57, %v2978_v28  ;;  %v1599_v19 = vmul.f32 %v3076_v57, %v2980_v6 }
 0x4cb   :  { %v1646_v9 = vmul.f32 0.2, %v1614_v30  ;;  %v1663_v29 = vmul.f32 0.2, %v1631_v5  ;;  %v1664_v32 = vmul.f32 0.2, %v1632_v10  ;;  %v1616_v23 = vadd.f32 %v3085_v15, %v1580_v55 }
 0x4cc   :  { %v1647_v47 = vmul.f32 0.2, %v1615_v35  ;;  %v1662_v3 = vmul.f32 0.2, %v1630_v13  ;;  %v1665_v34 = vmul.f32 0.2, %v1633_v37  ;;  %v1617_v51 = vadd.f32 %v3085_v15, %v1581_v16 }
 0x4cd   :  { %v1678_v45 = vmax.f32 %v1614_v30, %v1646_v9  ;;  %v1634_v12 = vadd.f32 %v3085_v15, %v1598_v48  ;;  %v1635_v33 = vadd.f32 %v3085_v15, %v1599_v19  ;;  %v1695_v56 = vmax.f32 %v1631_v5, %v1663_v29 }
 0x4ce   :  { %v1679_v7 = vmax.f32 %v1615_v35, %v1647_v47  ;;  %v1694_v42 = vmax.f32 %v1630_v13, %v1662_v3  ;;  %v1696_v38 = vmax.f32 %v1632_v10, %v1664_v32  ;;  %v1697_v22 = vmax.f32 %v1633_v37, %v1665_v34 }
 0x4cf   :  { %v1582_v6 = vmul.f32 %v3076_v57, %v2941_v21  ;;  %v1583_v26 = vmul.f32 %v3076_v57, %v2944_v25  ;;  %v1648_v61 = vmul.f32 0.2, %v1616_v23  ;;  %v1649_v63 = vmul.f32 0.2, %v1617_v51 }
 0x4d0   :  { %v1712_v28 = vpack.c.bf16 %v1679_v7, %v1678_v45  ;;  %v1720_v58 = vpack.c.bf16 %v1695_v56, %v1694_v42  ;;  %v1721_v44 = vpack.c.bf16 %v1697_v22, %v1696_v38  ;;  %v1600_v17 = vmul.f32 %v3076_v57, %v2982_v36 }
 0x4d1   :  { %v1601_v8 = vmul.f32 %v3076_v57, %v2984_v41  ;;  %v1666_v49 = vmul.f32 0.2, %v1634_v12  ;;  %v1667_v20 = vmul.f32 0.2, %v1635_v33  ;;  %v1618_v21 = vadd.f32 %v3085_v15, %v1582_v6 }
 0x4d2   :  { %1916 = vmatprep.subr.bf16.mxu1 %v1720_v58  ;;  %v1619_v40 = vadd.f32 %v3085_v15, %v1583_v26  ;;  %v1680_v54 = vmax.f32 %v1616_v23, %v1648_v61  ;;  %v1681_v25 = vmax.f32 %v1617_v51, %v1649_v63  ;;  %v1636_v30 = vadd.f32 %v3085_v15, %v1600_v17 }
 0x4d3   :  { %1917 = vmatpush3.bf16.xpose.msra.mxu1 %v1712_v28  ;;  %v1637_v35 = vadd.f32 %v3085_v15, %v1601_v8  ;;  %v1698_v13 = vmax.f32 %v1634_v12, %v1666_v49  ;;  %v1699_v36 = vmax.f32 %v1635_v33, %v1667_v20  ;;  %v1584_v41 = vmul.f32 %v3076_v57, %v2947_v59 }
 0x4d4   :  { %1918 = vmatprep.subr.bf16.mxu1 %v1721_v44  ;;  %v1585_v5 = vmul.f32 %v3076_v57, %v2950_v11  ;;  %v1602_v10 = vmul.f32 %v3076_v57, %v2986_v62  ;;  %v1650_v37 = vmul.f32 0.2, %v1618_v21  ;;  %v1651_v9 = vmul.f32 0.2, %v1619_v40 }
 0x4d5   :  { %v1713_v47 = vpack.c.bf16 %v1681_v25, %v1680_v54  ;;  %v1603_v55 = vmul.f32 %v3076_v57, %v2988_v1  ;;  %v1668_v16 = vmul.f32 0.2, %v1636_v30  ;;  %v1669_v48 = vmul.f32 0.2, %v1637_v35 }
 0x4d6   :  { %v1722_v19 = vpack.c.bf16 %v1699_v36, %v1698_v13  ;;  %v1620_v3 = vadd.f32 %v3085_v15, %v1584_v41  ;;  %v1621_v59 = vadd.f32 %v3085_v15, %v1585_v5  ;;  %v1682_v29 = vmax.f32 %v1618_v21, %v1650_v37 }
 0x4d7   :  { %v1683_v11 = vmax.f32 %v1619_v40, %v1651_v9  ;;  %v1638_v32 = vadd.f32 %v3085_v15, %v1602_v10  ;;  %v1639_v62 = vadd.f32 %v3085_v15, %v1603_v55  ;;  %v1700_v34 = vmax.f32 %v1636_v30, %v1668_v16 }
 0x4d8   :  { %v1701_v45 = vmax.f32 %v1637_v35, %v1669_v48  ;;  %v1586_v1 = vmul.f32 %v3076_v57, %v2952_v24  ;;  %v1587_v7 = vmul.f32 %v3076_v57, %v2954_v4  ;;  %v1604_v23 = vmul.f32 %v3076_v57, %v2990_v27 }
 0x4d9   :  { %v1652_v51 = vmul.f32 0.2, %v1620_v3  ;;  %v1653_v12 = vmul.f32 0.2, %v1621_v59  ;;  %v1714_v33 = vpack.c.bf16 %v1683_v11, %v1682_v29  ;;  %v1605_v42 = vmul.f32 %v3076_v57, %v2992_v53 }
 0x4da   :  { %v1670_v56 = vmul.f32 0.2, %v1638_v32  ;;  %v1671_v28 = vmul.f32 0.2, %v1639_v62  ;;  %v1723_v38 = vpack.c.bf16 %v1701_v45, %v1700_v34  ;;  %v1622_v22 = vadd.f32 %v3085_v15, %v1586_v1 }
 0x4db   :  { %1919 = vmatpush3.bf16.xpose.msra.mxu1 %v1713_v47  ;;  %v1623_v24 = vadd.f32 %v3085_v15, %v1587_v7  ;;  %v1684_v6 = vmax.f32 %v1620_v3, %v1652_v51  ;;  %v1685_v4 = vmax.f32 %v1621_v59, %v1653_v12  ;;  %v1640_v58 = vadd.f32 %v3085_v15, %v1604_v23 }
 0x4dc   :  { %1920 = vmatprep.subr.bf16.mxu1 %v1722_v19  ;;  %v1641_v27 = vadd.f32 %v3085_v15, %v1605_v42  ;;  %v1702_v26 = vmax.f32 %v1638_v32, %v1670_v56  ;;  %v1703_v61 = vmax.f32 %v1639_v62, %v1671_v28  ;;  %v1607_v53 = vmul.f32 %v3076_v57, %v2996_v39 }
 0x4dd   :  { %v1588_v63 = vmul.f32 %v3076_v57, %v2957_v14  ;;  %v1589_v44 = vmul.f32 %v3076_v57, %v2960_v43  ;;  %v1654_v17 = vmul.f32 0.2, %v1622_v22  ;;  %v1655_v8 = vmul.f32 0.2, %v1623_v24 }
 0x4de   :  { %v1715_v49 = vpack.c.bf16 %v1685_v4, %v1684_v6  ;;  %v1606_v20 = vmul.f32 %v3076_v57, %v2994_v2  ;;  %v1672_v21 = vmul.f32 0.2, %v1640_v58  ;;  %v1673_v40 = vmul.f32 0.2, %v1641_v27 }
 0x4df   :  { %v1724_v54 = vpack.c.bf16 %v1703_v61, %v1702_v26  ;;  %v1643_v25 = vadd.f32 %v3085_v15, %v1607_v53  ;;  %v1624_v39 = vadd.f32 %v3085_v15, %v1588_v63  ;;  %v1625_v14 = vadd.f32 %v3085_v15, %v1589_v44 }
 0x4e0   :  { %v1686_v30 = vmax.f32 %v1622_v22, %v1654_v17  ;;  %v1687_v35 = vmax.f32 %v1623_v24, %v1655_v8  ;;  %v1642_v43 = vadd.f32 %v3085_v15, %v1606_v20  ;;  %v1704_v13 = vmax.f32 %v1640_v58, %v1672_v21 }
 0x4e1   :  { %v1705_v36 = vmax.f32 %v1641_v27, %v1673_v40  ;;  %v1590_v2 = vmul.f32 %v3076_v57, %v2962_v46  ;;  %v1591_v41 = vmul.f32 %v3076_v57, %v2964_v60  ;;  %v1675_v5 = vmul.f32 0.2, %v1643_v25 }
 0x4e2   :  { %v1656_v10 = vmul.f32 0.2, %v1624_v39  ;;  %v1657_v37 = vmul.f32 0.2, %v1625_v14  ;;  %v1716_v9 = vpack.c.bf16 %v1687_v35, %v1686_v30  ;;  %v1608_v47 = vmul.f32 %v3076_v57, %v2998_v18 }
 0x4e3   :  { %1921 = vmatpush3.bf16.xpose.msra.mxu1 %v1714_v33  ;;  %v1609_v55 = vmul.f32 %v3076_v57, %v3000_v31  ;;  %v1674_v16 = vmul.f32 0.2, %v1642_v43  ;;  %v1725_v48 = vpack.c.bf16 %v1705_v36, %v1704_v13  ;;  %v1626_v19 = vadd.f32 %v3085_v15, %v1590_v2 }
 0x4e4   :  { %1922 = vmatprep.subr.bf16.mxu1 %v1723_v38  ;;  %v1627_v46 = vadd.f32 %v3085_v15, %v1591_v41  ;;  %v1688_v3 = vmax.f32 %v1624_v39, %v1656_v10  ;;  %v1689_v60 = vmax.f32 %v1625_v14, %v1657_v37  ;;  %v1644_v59 = vadd.f32 %v3085_v15, %v1608_v47 }
 0x4e5   :  { %v1645_v29 = vadd.f32 %v3085_v15, %v1609_v55  ;;  %v1706_v11 = vmax.f32 %v1642_v43, %v1674_v16  ;;  %v1707_v32 = vmax.f32 %v1643_v25, %v1675_v5  ;;  %v1592_v18 = vmul.f32 %v3076_v57, %v2966_v52 }
 0x4e6   :  { %v1593_v31 = vmul.f32 %v3076_v57, %v2968_v0  ;;  %v1658_v62 = vmul.f32 0.2, %v1626_v19  ;;  %v1659_v34 = vmul.f32 0.2, %v1627_v46  ;;  %v1717_v45 = vpack.c.bf16 %v1689_v60, %v1688_v3 }
 0x4e7   :  { %v1676_v1 = vmul.f32 0.2, %v1644_v59  ;;  %v1677_v7 = vmul.f32 0.2, %v1645_v29  ;;  %v1726_v23 = vpack.c.bf16 %v1707_v32, %v1706_v11  ;;  %v1628_v51 = vadd.f32 %v3085_v15, %v1592_v18 }
 0x4e8   :  { %v1629_v12 = vadd.f32 %v3085_v15, %v1593_v31  ;;  %v1690_v33 = vmax.f32 %v1626_v19, %v1658_v62  ;;  %v1691_v42 = vmax.f32 %v1627_v46, %v1659_v34  ;;  %v1729_v15 = vstv %s3196_s3 }
 0x4e9   :  { %v1708_v56 = vmax.f32 %v1644_v59, %v1676_v1  ;;  %v1709_v28 = vmax.f32 %v1645_v29, %v1677_v7  ;;  %v1660_v52 = vmul.f32 0.2, %v1628_v51 }
 0x4ea   :  { %v1661_v38 = vmul.f32 0.2, %v1629_v12  ;;  %v1718_v22 = vpack.c.bf16 %v1691_v42, %v1690_v33 }
 0x4eb   :  { %1923 = vmatpush3.bf16.xpose.msra.mxu1 %v1715_v49  ;;  %v1727_v0 = vpack.c.bf16 %v1709_v28, %v1708_v56  ;;  %v1692_v57 = vmax.f32 %v1628_v51, %v1660_v52 }
 0x4ec   :  { %1924 = vmatprep.subr.bf16.mxu1 %v1724_v54  ;;  %v1693_v24 = vmax.f32 %v1629_v12, %v1661_v38 }
 0x4ee   :  { %v1719_v6 = vpack.c.bf16 %v1693_v24, %v1692_v57 }
 0x4f3   :  { %1925 = vmatpush3.bf16.xpose.msra.mxu1 %v1716_v9 }
 0x4f4   :  { %1926 = vmatprep.subr.bf16.mxu1 %v1725_v48 }
 0x4fb   :  { %1927 = vmatpush3.bf16.xpose.msra.mxu1 %v1717_v45 }
 0x4fc   :  { %1928 = vmatprep.subr.bf16.mxu1 %v1726_v23 }
 0x503   :  { %1929 = vmatpush3.bf16.xpose.msra.mxu1 %v1718_v22 }
 0x504   :  { %1930 = vmatprep.subr.bf16.mxu1 %v1727_v0 }
 0x50b   :  { %1931 = vmatpush3.bf16.xpose.msra.mxu1 %v1719_v6 }
 0x512   :  { %1933 = vmatmul.mubr.bf16.vlgmr.msra.gmra.mrb[48].mxu1 %v3065_v50 }
 0x5e5   :  { %v1770_v4 = vpop.f32.mrb[48].mxu1 }
 0x5e6   :  { %v1771_v58 = vadd.f32 %v1770_v4, %v1729_v15  ;;  %v1772_v27 = vpop.f32.mrb[49].mxu1 }
 0x5e7   :  { %v1773_v26 = vadd.f32 %v1772_v27, %v1729_v15  ;;  %v1774_v61 = vpop.f32.mrb[50].mxu1 }
 0x5e8   :  { %1779 = vst [vmem:[%s3197_s4] sm:$0xff] %v1771_v58  ;;  %v1775_v53 = vadd.f32 %v1774_v61, %v1729_v15  ;;  %v1776_v63 = vpop.f32.mrb[51].mxu1 }
 0x5e9   :  { %1780 = vst [vmem:[%s3197_s4 + $0x8] sm:$0xff] %v1773_v26  ;;  %v1777_v50 = vadd.f32 %v1776_v63, %v1729_v15 }
 0x5ea   :  { %1781 = vst [vmem:[%s3197_s4 + $0x10] sm:$0xff] %v1775_v53 }
 0x5eb   :  { %1782 = vst [vmem:[%s3197_s4 + $0x18] sm:$0xff] %v1777_v50 }

</bundles_post_ra>
